<compile_context>
chip_gen: v7x
topology: tpu7x:2x2x1
jax: 0.10.0
libtpu: 0.0.40
codegen_flags: <defaults>
</compile_context>

<pallas_src>
import functools

import jax
import jax.numpy as jnp
import numpy as np
from jax import lax
from jax.experimental import pallas as pl
from jax.experimental.pallas import tpu as pltpu

_LANES = 128          # lane padding for the expert (matmul N) dimension
_K_SUBLANES = 8       # top_k rounded up to a sublane multiple for the output slab


def _round_up(a: int, b: int) -> int:
    return ((a + b - 1) // b) * b


# --------------------------------------------------------------------------- #
# Kernel
# --------------------------------------------------------------------------- #
def gate_kernel(x_ref, w_ref, wout_ref, iout_ref, *, top_k: int, num_experts: int):
    # ---- logits: MXU matmul, f32 accumulation.  (tm, e_pad) ----
    logits = jnp.dot(x_ref[...], w_ref[...], preferred_element_type=jnp.float32)
    tm, e_pad = logits.shape

    lane_idx = lax.broadcasted_iota(jnp.int32, (tm, e_pad), 1)
    neg_inf = jnp.float32(-jnp.inf)
    # Mask padded expert columns so they can never be selected.
    if e_pad > num_experts:
        work = jnp.where(lane_idx < num_experts, logits, neg_inf)
    else:
        work = logits

    # ---- iterative top-k directly on the logits (k small & static) ----
    # softmax is monotonic, so top-k indices match; renormalized top-k of the
    # softmax equals a softmax over just the k selected logits.
    vals, inds = [], []
    for _ in range(top_k):
        v = jnp.max(work, axis=-1, keepdims=True)                    # (tm, 1)
        i = jnp.min(jnp.where(work == v, lane_idx, e_pad),
                    axis=-1, keepdims=True)                          # first occurrence
        vals.append(v)
        inds.append(i)
        work = jnp.where(lane_idx == i, neg_inf, work)               # remove it

    # ---- softmax over the k selected logits (exact renormalized weights) ----
    m_sel = vals[0]                                                  # largest selected
    exps = [jnp.exp(v - m_sel) for v in vals]
    denom = exps[0]
    for e in exps[1:]:
        denom = denom + e
    inv = 1.0 / denom

    # ---- transposed outputs: (ksub, tm), tokens on lanes ----
    # Build small (tm, ksub) stacks (ksub = 8 sublanes) and transpose once,
    # so the HBM writeback is ksub*(4+4) bytes/token instead of 1 KiB/token.
    ksub = wout_ref.shape[0]
    kpos = lax.broadcasted_iota(jnp.int32, (tm, ksub), 1)
    w_stack = jnp.zeros((tm, ksub), jnp.float32)
    i_stack = jnp.zeros((tm, ksub), jnp.int32)
    for j in range(top_k):
        w_stack = jnp.where(kpos == j, exps[j] * inv, w_stack)
        i_stack = jnp.where(kpos == j, inds[j], i_stack)

    wout_ref[...] = w_stack.T.astype(wout_ref.dtype)
    iout_ref[...] = i_stack.T


# --------------------------------------------------------------------------- #
# VMEM budgeting / tile choice (generation aware)
# --------------------------------------------------------------------------- #
def _vmem_limit_bytes() -> int:
    """~75% of physical per-core VMEM (48 MiB on v7x, 96 MiB on v5e/v6e)."""
    cap = 64 * 1024 * 1024  # conservative fallback (v7x per-core size)
    try:
        cap = int(pltpu.get_tpu_info().vmem_capacity_bytes)
    except Exception:
        pass
    return (cap * 3) // 4


def _choose_token_tile(input_dim: int, e_pad: int, x_itemsize: int,
                       w_itemsize: int, out_w_itemsize: int, ksub: int,
                       budget: int) -> int:
    """Largest 128-multiple token tile that fits the VMEM budget."""
    fixed = input_dim * e_pad * w_itemsize               # weight block, single-buffered
    per_row = (2 * input_dim * x_itemsize                # x block, double-buffered
               + 2 * ksub * (out_w_itemsize + 4)         # both outputs, double-buffered
               + 6 * e_pad * 4)                          # f32/i32 in-kernel temporaries
    tm = (budget - fixed) // per_row
    tm = int(max(128, min(tm, 2048)))
    return (tm // 128) * 128


# --------------------------------------------------------------------------- #
# Wrapper
# --------------------------------------------------------------------------- #
def prepare_gate_weight(gate_weight, dtype=None):
    """One-time weight preprocessing (hoisted out of the per-call path).

    gate_weight: (num_experts, input_dim) torch-Linear layout.
    Returns (w_t_padded, num_experts) with w_t_padded: (input_dim, e_pad).
    """
    num_experts, _ = gate_weight.shape
    e_pad = _round_up(max(num_experts, _LANES), _LANES)
    w_t = gate_weight.T
    if dtype is not None:
        w_t = w_t.astype(dtype)
    if e_pad != num_experts:
        w_t = jnp.pad(w_t, ((0, 0), (0, e_pad - num_experts)))
    return w_t, num_experts


def gate_forward(x, w_prepared, num_experts: int, top_k: int, compute_dtype=None):
    """x: (..., input_dim); w_prepared: (input_dim, e_pad) from prepare_gate_weight."""
    orig_lead = x.shape[:-1]
    orig_dtype = x.dtype
    input_dim = x.shape[-1]
    assert w_prepared.shape[0] == input_dim
    e_pad = w_prepared.shape[1]
    tokens = int(np.prod(orig_lead)) if orig_lead else 1

    xf = x.reshape(tokens, input_dim)
    # Optional bf16 compute path (halves the dominant x HBM read). Off by
    # default so index selection stays bit-exact with the f32 reference.
    if compute_dtype is not None:
        xf = xf.astype(compute_dtype)
    if w_prepared.dtype != xf.dtype:
        w_prepared = w_prepared.astype(xf.dtype)

    x_itemsize = jnp.dtype(xf.dtype).itemsize
    w_itemsize = jnp.dtype(w_prepared.dtype).itemsize
    out_w_itemsize = jnp.dtype(orig_dtype).itemsize
    ksub = _round_up(top_k, _K_SUBLANES)

    vmem_limit = _vmem_limit_bytes()
    tile_budget = (vmem_limit * 4) // 5        # headroom for unaccounted scratch

    tokens128 = _round_up(tokens, 128)
    tm = _choose_token_tile(input_dim, e_pad, x_itemsize, w_itemsize,
                            out_w_itemsize, ksub, tile_budget)
    tm = min(tm, tokens128)
    # Keep >= 2 grid steps when the batch allows, so the "parallel" token axis
    # actually spans both TensorCores on v7x (harmless on single-TC chips).
    if tokens128 >= 2 * 128:
        tm = min(tm, max(128, ((tokens128 // 2) // 128) * 128))

    tokens_pad = _round_up(tokens, tm)
    if tokens_pad != tokens:
        xf = jnp.pad(xf, ((0, tokens_pad - tokens), (0, 0)))
    grid = (tokens_pad // tm,)

    cost = pl.CostEstimate(
        flops=2 * tokens_pad * input_dim * e_pad,
        transcendentals=tokens_pad * top_k,
        bytes_accessed=(tokens_pad * input_dim * x_itemsize
                        + input_dim * e_pad * w_itemsize
                        + tokens_pad * ksub * (out_w_itemsize + 4)),
    )

    out_w, out_i = pl.pallas_call(
        functools.partial(gate_kernel, top_k=top_k, num_experts=num_experts),
        out_shape=(
            jax.ShapeDtypeStruct((ksub, tokens_pad), orig_dtype),
            jax.ShapeDtypeStruct((ksub, tokens_pad), jnp.int32),
        ),
        grid_spec=pltpu.PrefetchScalarGridSpec(
            num_scalar_prefetch=0,
            grid=grid,
            in_specs=[
                pl.BlockSpec((tm, input_dim), lambda i: (i, 0)),
                # Constant weight block: single-buffer it (no second copy).
                pl.BlockSpec((input_dim, e_pad), lambda i: (0, 0),
                             pipeline_mode=pl.Buffered(1)),
            ],
            out_specs=[
                pl.BlockSpec((ksub, tm), lambda i: (0, i)),
                pl.BlockSpec((ksub, tm), lambda i: (0, i)),
            ],
        ),
        compiler_params=pltpu.CompilerParams(
            dimension_semantics=("parallel",),   # shards token tiles across TCs on v7x
            vmem_limit_bytes=vmem_limit,
        ),
        cost_estimate=cost,
    )(xf, w_prepared)

    # Cheap wrapper-side slice + transpose back to (..., top_k).
    w = out_w[:top_k, :tokens].T.reshape(*orig_lead, top_k)
    i = out_i[:top_k, :tokens].T.reshape(*orig_lead, top_k)
    return w, i


def gate_apply(x, gate_weight, top_k: int):
    """Convenience: prepare weights (normally done once at init) and run."""
    w_prepared, num_experts = prepare_gate_weight(gate_weight, dtype=x.dtype)
    return gate_forward(x, w_prepared, num_experts, top_k)


# --------------------------------------------------------------------------- #
# Pure-JAX reference
# --------------------------------------------------------------------------- #
def gate_reference(x, gate_weight, top_k: int):
    logits = jnp.einsum("...d,ed->...e", x, gate_weight)
    probs = jax.nn.softmax(logits.astype(jnp.float32), axis=-1)
    tw, ti = jax.lax.top_k(probs, top_k)
    tw = tw / jnp.sum(tw, axis=-1, keepdims=True)
    return tw.astype(x.dtype), ti.astype(jnp.int32)


if __name__ == "__main__":
    # Small shapes consistent with the module: batch=2, seq=8, hidden=32,
    # num_experts=8, top_k=2.
    batch, seq, input_dim, num_experts, top_k = 2, 8, 32, 8, 2

    key = jax.random.PRNGKey(0)
    kx, kw = jax.random.split(key)
    x = jax.random.normal(kx, (batch, seq, input_dim), dtype=jnp.float32)
    # deterministic init of gate_linear.weight: (num_experts, input_dim)
    gate_weight = (jax.random.normal(kw, (num_experts, input_dim), dtype=jnp.float32)
                   * (1.0 / np.sqrt(input_dim)))

    # Weight preprocessing hoisted: done once, reused across calls.
    w_prepared, n_exp = prepare_gate_weight(gate_weight, dtype=x.dtype)

    w_out, i_out = gate_forward(x, w_prepared, n_exp, top_k)
    jax.block_until_ready(w_out)
    jax.block_until_ready(i_out)

    w_ref, i_ref = gate_reference(x, gate_weight, top_k)
    assert w_out.shape == (batch, seq, top_k) and i_out.shape == (batch, seq, top_k)
    assert i_out.dtype == jnp.int32
    np.testing.assert_allclose(np.asarray(w_out), np.asarray(w_ref),
                               rtol=1e-5, atol=1e-5)
    np.testing.assert_array_equal(np.asarray(i_out), np.asarray(i_ref))

    print("KERNEL_OK")
</pallas_src>

<mosaic_0001>
module attributes {stable_mosaic.version = 11 : i64} {
  func.func @gate_kernel(%arg0: i32, %arg1: memref<128x32xf32, #tpu.memory_space<vmem>>, %arg2: memref<32x128xf32, #tpu.memory_space<vmem>>, %arg3: memref<8x128xf32, #tpu.memory_space<vmem>>, %arg4: memref<8x128xi32, #tpu.memory_space<vmem>>) attributes {dimension_semantics = [#tpu.dimension_semantics<parallel>], iteration_bounds = array<i64: 1>, scalar_prefetch = 0 : i64, scratch_operands = 0 : i64, tpu.core_type = #tpu.core_type<tc>, window_params = [{transform_indices = @transform_0, window_bounds = array<i64: 128, 32>}, {pipeline_mode = #tpu.pipeline_mode<synchronous>, transform_indices = @transform_1, window_bounds = array<i64: 32, 128>}, {transform_indices = @transform_2, window_bounds = array<i64: 8, 128>}, {transform_indices = @transform_3, window_bounds = array<i64: 8, 128>}]} {
    %c0 = arith.constant 0 : index
    %c0_0 = arith.constant 0 : index
    %0 = vector.load %arg1[%c0, %c0_0] : memref<128x32xf32, #tpu.memory_space<vmem>>, vector<128x32xf32>
    %c0_1 = arith.constant 0 : index
    %c0_2 = arith.constant 0 : index
    %1 = vector.load %arg2[%c0_1, %c0_2] : memref<32x128xf32, #tpu.memory_space<vmem>>, vector<32x128xf32>
    %cst = arith.constant dense<0.000000e+00> : vector<128x128xf32>
    %2 = tpu.matmul %0, %1, %cst {dimension_numbers = #tpu.dot_dimension_numbers<[1], [0], [0], [1], [0, 0, 1, 1], [], []>} : vector<128x32xf32>, vector<32x128xf32>, vector<128x128xf32> -> vector<128x128xf32>
    %3 = tpu.iota {dimensions = array<i32: 1>} : vector<128x128xi32>
    %c8_i32 = arith.constant 8 : i32
    %4 = vector.broadcast %c8_i32 : i32 to vector<128x128xi32>
    %5 = arith.cmpi slt, %3, %4 : vector<128x128xi32>
    %cst_3 = arith.constant 0xFF800000 : f32
    %6 = vector.broadcast %cst_3 : f32 to vector<128x128xf32>
    %7 = arith.select %5, %2, %6 : vector<128x128xi1>, vector<128x128xf32>
    %cst_4 = arith.constant dense<0xFF800000> : vector<128xf32>
    %8 = vector.multi_reduction <maximumf>, %7, %cst_4 [1] : vector<128x128xf32> to vector<128xf32>
    %9 = vector.shape_cast %8 : vector<128xf32> to vector<128x1xf32>
    %10 = vector.broadcast %9 : vector<128x1xf32> to vector<128x128xf32>
    %11 = arith.cmpf oeq, %7, %10 : vector<128x128xf32>
    %c128_i32 = arith.constant 128 : i32
    %12 = vector.broadcast %c128_i32 : i32 to vector<128x128xi32>
    %13 = arith.select %11, %3, %12 : vector<128x128xi1>, vector<128x128xi32>
    %cst_5 = arith.constant dense<2147483647> : vector<128xi32>
    %14 = vector.multi_reduction <minsi>, %13, %cst_5 [1] : vector<128x128xi32> to vector<128xi32>
    %15 = vector.shape_cast %14 : vector<128xi32> to vector<128x1xi32>
    %16 = vector.broadcast %15 : vector<128x1xi32> to vector<128x128xi32>
    %17 = arith.cmpi eq, %3, %16 : vector<128x128xi32>
    %cst_6 = arith.constant 0xFF800000 : f32
    %18 = vector.broadcast %cst_6 : f32 to vector<128x128xf32>
    %19 = arith.select %17, %18, %7 : vector<128x128xi1>, vector<128x128xf32>
    %cst_7 = arith.constant dense<0xFF800000> : vector<128xf32>
    %20 = vector.multi_reduction <maximumf>, %19, %cst_7 [1] : vector<128x128xf32> to vector<128xf32>
    %21 = vector.shape_cast %20 : vector<128xf32> to vector<128x1xf32>
    %22 = vector.broadcast %21 : vector<128x1xf32> to vector<128x128xf32>
    %23 = arith.cmpf oeq, %19, %22 : vector<128x128xf32>
    %c128_i32_8 = arith.constant 128 : i32
    %24 = vector.broadcast %c128_i32_8 : i32 to vector<128x128xi32>
    %25 = arith.select %23, %3, %24 : vector<128x128xi1>, vector<128x128xi32>
    %cst_9 = arith.constant dense<2147483647> : vector<128xi32>
    %26 = vector.multi_reduction <minsi>, %25, %cst_9 [1] : vector<128x128xi32> to vector<128xi32>
    %27 = vector.shape_cast %26 : vector<128xi32> to vector<128x1xi32>
    %28 = arith.subf %9, %9 : vector<128x1xf32>
    %29 = math.exp %28 : vector<128x1xf32>
    %30 = arith.subf %21, %9 : vector<128x1xf32>
    %31 = math.exp %30 : vector<128x1xf32>
    %32 = arith.addf %29, %31 : vector<128x1xf32>
    %cst_10 = arith.constant 1.000000e+00 : f32
    %33 = vector.broadcast %cst_10 : f32 to vector<128x1xf32>
    %34 = arith.divf %33, %32 : vector<128x1xf32>
    %35 = tpu.iota {dimensions = array<i32: 1>} : vector<128x8xi32>
    %cst_11 = arith.constant 0.000000e+00 : f32
    %36 = vector.broadcast %cst_11 : f32 to vector<128x8xf32>
    %c0_i32 = arith.constant 0 : i32
    %37 = vector.broadcast %c0_i32 : i32 to vector<128x8xi32>
    %c0_i32_12 = arith.constant 0 : i32
    %38 = vector.broadcast %c0_i32_12 : i32 to vector<128x8xi32>
    %39 = arith.cmpi eq, %35, %38 : vector<128x8xi32>
    %40 = arith.mulf %29, %34 : vector<128x1xf32>
    %41 = vector.shape_cast %40 : vector<128x1xf32> to vector<128x1xf32>
    %42 = vector.broadcast %41 : vector<128x1xf32> to vector<128x8xf32>
    %43 = arith.select %39, %42, %36 : vector<128x8xi1>, vector<128x8xf32>
    %c0_i32_13 = arith.constant 0 : i32
    %44 = vector.broadcast %c0_i32_13 : i32 to vector<128x8xi32>
    %45 = arith.cmpi eq, %35, %44 : vector<128x8xi32>
    %46 = vector.shape_cast %15 : vector<128x1xi32> to vector<128x1xi32>
    %47 = vector.broadcast %46 : vector<128x1xi32> to vector<128x8xi32>
    %48 = arith.select %45, %47, %37 : vector<128x8xi1>, vector<128x8xi32>
    %c1_i32 = arith.constant 1 : i32
    %49 = vector.broadcast %c1_i32 : i32 to vector<128x8xi32>
    %50 = arith.cmpi eq, %35, %49 : vector<128x8xi32>
    %51 = arith.mulf %31, %34 : vector<128x1xf32>
    %52 = vector.shape_cast %51 : vector<128x1xf32> to vector<128x1xf32>
    %53 = vector.broadcast %52 : vector<128x1xf32> to vector<128x8xf32>
    %54 = arith.select %50, %53, %43 : vector<128x8xi1>, vector<128x8xf32>
    %c1_i32_14 = arith.constant 1 : i32
    %55 = vector.broadcast %c1_i32_14 : i32 to vector<128x8xi32>
    %56 = arith.cmpi eq, %35, %55 : vector<128x8xi32>
    %57 = vector.shape_cast %27 : vector<128x1xi32> to vector<128x1xi32>
    %58 = vector.broadcast %57 : vector<128x1xi32> to vector<128x8xi32>
    %59 = arith.select %56, %58, %48 : vector<128x8xi1>, vector<128x8xi32>
    %60 = tpu.transpose %54, [1, 0] : vector<128x8xf32> -> vector<8x128xf32>
    %c0_15 = arith.constant 0 : index
    %c0_16 = arith.constant 0 : index
    %61 = vector.load %arg3[%c0_15, %c0_16] : memref<8x128xf32, #tpu.memory_space<vmem>>, vector<8x128xf32>
    tpu.vector_store %arg3[%c0_15, %c0_16], %60 {strides = array<i32>} : memref<8x128xf32, #tpu.memory_space<vmem>>, vector<8x128xf32>,
    %62 = tpu.transpose %59, [1, 0] : vector<128x8xi32> -> vector<8x128xi32>
    %c0_17 = arith.constant 0 : index
    %c0_18 = arith.constant 0 : index
    %63 = vector.load %arg4[%c0_17, %c0_18] : memref<8x128xi32, #tpu.memory_space<vmem>>, vector<8x128xi32>
    tpu.vector_store %arg4[%c0_17, %c0_18], %62 {strides = array<i32>} : memref<8x128xi32, #tpu.memory_space<vmem>>, vector<8x128xi32>,
    return
  }
  func.func @transform_0(%arg0: i32) -> (i32, i32) {
    %c0_i32 = arith.constant 0 : i32
    %c0_i32_0 = arith.constant 0 : i32
    return %arg0, %c0_i32 : i32, i32
  }
  func.func @transform_1(%arg0: i32) -> (i32, i32) {
    %c0_i32 = arith.constant 0 : i32
    %c0_i32_0 = arith.constant 0 : i32
    %c0_i32_1 = arith.constant 0 : i32
    return %c0_i32, %c0_i32_0 : i32, i32
  }
  func.func @transform_2(%arg0: i32) -> (i32, i32) {
    %c0_i32 = arith.constant 0 : i32
    %c0_i32_0 = arith.constant 0 : i32
    return %c0_i32, %arg0 : i32, i32
  }
  func.func @transform_3(%arg0: i32) -> (i32, i32) {
    %c0_i32 = arith.constant 0 : i32
    %c0_i32_0 = arith.constant 0 : i32
    return %c0_i32, %arg0 : i32, i32
  }
}

</mosaic_0001>

<bundles_post_ra>
// kernel: tpu_custom_call.1
= control target key start
LH: loop header
LB: loop body
LE: loop exit
PB: predicated region body
PF: predicated region fallthrough
CT: control target
= control target key end

     0   :  { %9 = vsyncpa [#allocation3], 0  ;;  %vm35_vm0 = vcmask 261120   ;;  %s2588_s0 = inlined_call_operand.vmem [shape: f32[128,32], index: 0, kind: input, shape index: {}]   ;;  %s2589_s1 = inlined_call_operand.vmem [shape: f32[32,128], index: 1, kind: input, shape index: {}]   ;;  %s2590_s2 = inlined_call_operand.hbm [shape: f32[8,128], index: 2, kind: output, shape index: {0}]   ;;  %s2591_s3 = inlined_call_operand.hbm [shape: s32[8,128], index: 3, kind: output, shape index: {1}]  }
   0x1   :  { %v31_v0 = vld [vmem:[%s2589_s1] sm:$0xff]  ;;  %v32_v1 = vld [vmem:[%s2589_s1 + $0x8] sm:$0xff]  ;;  %v33_v2 = vld [vmem:[%s2589_s1 + $0x10] sm:$0xff] }
   0x2   :  { %v1260_v3 = vpack.c.bf16 %v32_v1, %v31_v0  ;;  %v34_v4 = vld [vmem:[%s2589_s1 + $0x18] sm:$0xff]  ;;  %v15_v5 = vld [vmem:[%s2588_s0] sm:$0xff] }
   0x3   :  { %v1264_v6 = vpack.c.bf16 %v34_v4, %v33_v2  ;;  %1236 = vmatprep.mubr.msk.f32.mxu0 %vm35_vm0, %v15_v5  ;;  %v23_v7 = vld [vmem:[%s2588_s0 + $0x40] sm:$0xff] }
   0x4   :  { %1261 = vmatprep.subr.bf16.mxu0 %v1260_v3  ;;  %1268 = vmatprep.subr.bf16.mxu1 %v1260_v3 }
   0x5   :  { %1263 = vmatpush3.bf16.msra.mxu0 %v1260_v3  ;;  %1270 = vmatpush3.bf16.msra.mxu1 %v1260_v3 }
   0x6   :  { %1265 = vmatprep.subr.bf16.mxu0 %v1264_v6  ;;  %1269 = vmatprep.subr.bf16.mxu1 %v1264_v6 }
   0x7   :  { %1248 = vmatprep.mubr.msk.f32.mxu1 %vm35_vm0, %v23_v7 }
   0x8   :  { %10 = vsyncpa [#allocation5], 0  ;;  %v16_v8 = vld [vmem:[%s2588_s0 + $0x8] sm:$0xff]  ;;  %v17_v10 = vld [vmem:[%s2588_s0 + $0x10] sm:$0xff]  ;;  %v229_v22 = vlaneseq }
   0x9   :  { %1267 = vmatpush3.bf16.msra.mxu0 %v1264_v6  ;;  %1271 = vmatpush3.bf16.msra.mxu1 %v1264_v6  ;;  %v24_v9 = vld [vmem:[%s2588_s0 + $0x48] sm:$0xff]  ;;  %v25_v11 = vld [vmem:[%s2588_s0 + $0x50] sm:$0xff]  ;;  %v18_v12 = vld [vmem:[%s2588_s0 + $0x18] sm:$0xff] }
   0xa   :  { %v26_v13 = vld [vmem:[%s2588_s0 + $0x58] sm:$0xff]  ;;  %v19_v14 = vld [vmem:[%s2588_s0 + $0x20] sm:$0xff]  ;;  %v20_v16 = vld [vmem:[%s2588_s0 + $0x28] sm:$0xff]  ;;  %v1516_v23 = vand.u32 127, %v229_v22 }
   0xb   :  { %v27_v15 = vld [vmem:[%s2588_s0 + $0x60] sm:$0xff]  ;;  %v28_v17 = vld [vmem:[%s2588_s0 + $0x68] sm:$0xff]  ;;  %v21_v18 = vld [vmem:[%s2588_s0 + $0x30] sm:$0xff] }
   0xc   :  { %1237 = vmatmul.mubr.msk.f32.vlgmr.msra.gmra.mrb[0].mxu0 %vm35_vm0, %v16_v8  ;;  %1249 = vmatmul.mubr.msk.f32.vlgmr.msra.gmra.mrb[0].mxu1 %vm35_vm0, %v24_v9  ;;  %v29_v19 = vld [vmem:[%s2588_s0 + $0x70] sm:$0xff]  ;;  %v22_v20 = vld [vmem:[%s2588_s0 + $0x38] sm:$0xff]  ;;  %vm231_vm1 = vcmp.lt.s32.totalorder %v1516_v23, 8 }
   0xd   :  { %1239 = vmatprep.mubr.msk.f32.mxu0 %vm35_vm0, %v17_v10  ;;  %1251 = vmatprep.mubr.msk.f32.mxu1 %vm35_vm0, %v25_v11  ;;  %v30_v21 = vld [vmem:[%s2588_s0 + $0x78] sm:$0xff]  ;;  %s1418_s0 = smov [#allocation2]  }
   0xe   :  { %s1170_s1 = sshll.u32 %s1418_s0, 4  ;;  %s1171_s1 = int_to_ptr.vmem [resolvable:$true] %s1170_s1 }
   0xf   :  { %s1370_s24 = scalar_lea.vmem %s1171_s1, 128  ;;  %p1375_p1 = scmp.lt.s32.totalorder %s1171_s1, %s1171_s1 }
  0x10   :  { %1240 = vmatmul.mubr.msk.f32.gmra.mrb[2].mxu0 %vm35_vm0, %v18_v12  ;;  %1252 = vmatmul.mubr.msk.f32.gmra.mrb[2].mxu1 %vm35_vm0, %v26_v13  ;;  %p1371_p0 = scmp.ne.s32.totalorder %s1171_s1, %s1370_s24  ;;  %p1376_p2 = scmp.lt.s32.totalorder %s1370_s24, %s1370_s24 }
  0x11   :  { %1242 = vmatprep.mubr.msk.f32.mxu0 %vm35_vm0, %v19_v14  ;;  %1254 = vmatprep.mubr.msk.f32.mxu1 %vm35_vm0, %v27_v15 }
  0x12   :  { %p1377_p3 = por %p1376_p2, %p1375_p1 }
  0x14   :  { %1243 = vmatmul.mubr.msk.f32.gmra.mrb[4].mxu0 %vm35_vm0, %v20_v16  ;;  %1255 = vmatmul.mubr.msk.f32.gmra.mrb[4].mxu1 %vm35_vm0, %v28_v17  ;;  %p1378_p4 = pnand %p1377_p3, %p1371_p0 }
  0x15   :  { %1245 = vmatprep.mubr.msk.f32.mxu0 %vm35_vm0, %v21_v18  ;;  %1257 = vmatprep.mubr.msk.f32.mxu1 %vm35_vm0, %v29_v19 }
  0x18   :  { %1246 = vmatmul.mubr.msk.f32.gmra.mrb[6].mxu0 %vm35_vm0, %v22_v20  ;;  %1258 = vmatmul.mubr.msk.f32.gmra.mrb[6].mxu1 %vm35_vm0, %v30_v21 }
  0xdf   :  { %v1238_v24 = vpop.f32.mrb[0].mxu0  ;;  %v1250_v25 = vpop.f32.mrb[0].mxu1 }
  0xe0   :  { %v150_v26 = vpop.f32.mrb[1].mxu0  ;;  %v190_v27 = vpop.f32.mrb[1].mxu1  ;;  %v1526_v33 = vsel %vm231_vm1, %v1238_v24, -inf  ;;  %v1570_v50 = vsel %vm231_vm1, %v1250_v25, -inf }
  0xe1   :  { %v1521_v28 = vsel %vm231_vm1, %v150_v26, -inf  ;;  %v1556_v47 = vsel %vm231_vm1, %v190_v27, -inf }
  0xe2   :  { %248 = vmax.xlane.f32.xlu0 %v1521_v28 }
  0xe3   :  { %v1241_v29 = vpop.f32.mrb[2].mxu0  ;;  %v1253_v30 = vpop.f32.mrb[2].mxu1 }
  0xe4   :  { %v160_v31 = vpop.f32.mrb[3].mxu0  ;;  %v200_v32 = vpop.f32.mrb[3].mxu1  ;;  %v1536_v39 = vsel %vm231_vm1, %v1241_v29, -inf  ;;  %v1576_v51 = vsel %vm231_vm1, %v1253_v30, -inf }
  0xe5   :  { %v1530_v34 = vsel %vm231_vm1, %v160_v31, -inf  ;;  %v1566_v49 = vsel %vm231_vm1, %v200_v32, -inf }
  0xe6   :  { %250 = vmax.xlane.f32.xlu0 %v1526_v33  ;;  %252 = vmax.xlane.f32.xlu1 %v1530_v34 }
  0xe7   :  { %v1244_v35 = vpop.f32.mrb[4].mxu0  ;;  %v1256_v36 = vpop.f32.mrb[4].mxu1 }
  0xe8   :  { %v170_v37 = vpop.f32.mrb[5].mxu0  ;;  %v210_v38 = vpop.f32.mrb[5].mxu1  ;;  %v1546_v45 = vsel %vm231_vm1, %v1244_v35, -inf  ;;  %v1586_v53 = vsel %vm231_vm1, %v1256_v36, -inf }
  0xe9   :  { %v1540_v40 = vsel %vm231_vm1, %v170_v37, -inf  ;;  %v1580_v52 = vsel %vm231_vm1, %v210_v38, -inf }
  0xea   :  { %254 = vmax.xlane.f32.xlu1 %v1536_v39  ;;  %256 = vmax.xlane.f32.xlu0 %v1540_v40 }
  0xeb   :  { %v1247_v41 = vpop.f32.mrb[6].mxu0  ;;  %v1259_v42 = vpop.f32.mrb[6].mxu1 }
  0xec   :  { %v180_v43 = vpop.f32.mrb[7].mxu0  ;;  %v220_v44 = vpop.f32.mrb[7].mxu1  ;;  %v1560_v48 = vsel %vm231_vm1, %v1247_v41, -inf  ;;  %v1596_v55 = vsel %vm231_vm1, %v1259_v42, -inf }
  0xed   :  { %v1550_v46 = vsel %vm231_vm1, %v180_v43, -inf  ;;  %v1590_v54 = vsel %vm231_vm1, %v220_v44, -inf }
  0xee   :  { %258 = vmax.xlane.f32.xlu1 %v1546_v45  ;;  %260 = vmax.xlane.f32.xlu0 %v1550_v46 }
  0xf2   :  { %262 = vmax.xlane.f32.xlu1 %v1560_v48  ;;  %264 = vmax.xlane.f32.xlu0 %v1556_v47 }
  0xf6   :  { %266 = vmax.xlane.f32.xlu1 %v1570_v50  ;;  %268 = vmax.xlane.f32.xlu0 %v1566_v49 }
  0xfa   :  { %270 = vmax.xlane.f32.xlu1 %v1576_v51  ;;  %272 = vmax.xlane.f32.xlu0 %v1580_v52 }
  0xfe   :  { %274 = vmax.xlane.f32.xlu1 %v1586_v53  ;;  %276 = vmax.xlane.f32.xlu0 %v1590_v54 }
 0x102   :  { %278 = vmax.xlane.f32.xlu1 %v1596_v55 }
 0x16f   :  { %v1599_v56 = vpop.xlane.xlu0 %248 }
 0x170   :  { %vm280_vm2 = vcmp.eq.f32.partialorder %v1521_v28, %v1599_v56 }
 0x171   :  { %v1604_v57 = vsel %vm280_vm2, %v1516_v23, 128 }
 0x172   :  { %v313_v58 = vshra.s32 %v1604_v57, 16 }
 0x173   :  { %v1607_v59 = vpop.xlane.xlu0 %250  ;;  %v1609_v60 = vpop.xlane.xlu1 %252 }
 0x174   :  { %vm281_vm3 = vcmp.eq.f32.partialorder %v1526_v33, %v1607_v59  ;;  %vm282_vm4 = vcmp.eq.f32.partialorder %v1530_v34, %v1609_v60  ;;  %v1615_v61 = vcvt.s32.f32 %v313_v58 }
 0x175   :  { %v1618_v62 = vsel %vm281_vm3, %v1516_v23, 128  ;;  %v1621_v63 = vsel %vm282_vm4, %v1516_v23, 128 }
 0x176   :  { %v327_v0 = vshra.s32 %v1618_v62, 16  ;;  %v341_v1 = vshra.s32 %v1621_v63, 16  ;;  %316 = vmin.xlane.f32.xlu0 %v1615_v61 }
 0x177   :  { %v1626_v2 = vpop.xlane.xlu1 %254  ;;  %v1628_v3 = vpop.xlane.xlu0 %256 }
 0x178   :  { %2635 = vst [vmem:[#allocation8_spill] sm:$0xff] %v1628_v3  ;;  %vm283_vm5 = vcmp.eq.f32.partialorder %v1536_v39, %v1626_v2  ;;  %vm284_vm6 = vcmp.eq.f32.partialorder %v1540_v40, %v1628_v3  ;;  %v1634_v4 = vcvt.s32.f32 %v327_v0  ;;  %v1636_v5 = vcvt.s32.f32 %v341_v1 }
 0x179   :  { %v1639_v6 = vsel %vm283_vm5, %v1516_v23, 128  ;;  %v1642_v7 = vsel %vm284_vm6, %v1516_v23, 128 }
 0x17a   :  { %330 = vmin.xlane.f32.xlu1 %v1634_v4  ;;  %344 = vmin.xlane.f32.xlu0 %v1636_v5  ;;  %v355_v10 = vshra.s32 %v1639_v6, 16  ;;  %v369_v11 = vshra.s32 %v1642_v7, 16  ;;  %v368_v3 = vand.u32 65535, %v1642_v7 }
 0x17b   :  { %v1646_v8 = vpop.xlane.xlu1 %258  ;;  %v1648_v9 = vpop.xlane.xlu0 %260 }
 0x17c   :  { %2636 = vst [vmem:[#allocation9_spill] sm:$0xff] %v1646_v8  ;;  %2637 = vst [vmem:[#allocation10_spill] sm:$0xff] %v1648_v9  ;;  %vm285_vm7 = vcmp.eq.f32.partialorder %v1546_v45, %v1646_v8  ;;  %vm286_vm8 = vcmp.eq.f32.partialorder %v1550_v46, %v1648_v9  ;;  %v1656_v12 = vcvt.s32.f32 %v355_v10  ;;  %v1658_v13 = vcvt.s32.f32 %v369_v11 }
 0x17d   :  { %v1661_v14 = vsel %vm285_vm7, %v1516_v23, 128  ;;  %v1664_v15 = vsel %vm286_vm8, %v1516_v23, 128 }
 0x17e   :  { %358 = vmin.xlane.f32.xlu1 %v1656_v12  ;;  %372 = vmin.xlane.f32.xlu0 %v1658_v13  ;;  %v383_v18 = vshra.s32 %v1661_v14, 16  ;;  %v397_v19 = vshra.s32 %v1664_v15, 16  ;;  %v396_v7 = vand.u32 65535, %v1664_v15 }
 0x17f   :  { %v1668_v16 = vpop.xlane.xlu1 %262  ;;  %v1670_v17 = vpop.xlane.xlu0 %264 }
 0x180   :  { %2638 = vst [vmem:[#allocation11_spill] sm:$0xff] %v1668_v16  ;;  %2639 = vst [vmem:[#allocation12_spill] sm:$0xff] %v1670_v17  ;;  %vm287_vm9 = vcmp.eq.f32.partialorder %v1560_v48, %v1668_v16  ;;  %vm288_vm10 = vcmp.eq.f32.partialorder %v1556_v47, %v1670_v17  ;;  %v1678_v20 = vcvt.s32.f32 %v383_v18  ;;  %v1680_v21 = vcvt.s32.f32 %v397_v19 }
 0x181   :  { %v1683_v22 = vsel %vm287_vm9, %v1516_v23, 128  ;;  %v1686_v24 = vsel %vm288_vm10, %v1516_v23, 128 }
 0x182   :  { %386 = vmin.xlane.f32.xlu1 %v1678_v20  ;;  %400 = vmin.xlane.f32.xlu0 %v1680_v21  ;;  %v411_v27 = vshra.s32 %v1683_v22, 16  ;;  %v425_v29 = vshra.s32 %v1686_v24, 16  ;;  %v424_v15 = vand.u32 65535, %v1686_v24 }
 0x183   :  { %v1690_v25 = vpop.xlane.xlu1 %266  ;;  %v1692_v26 = vpop.xlane.xlu0 %268 }
 0x184   :  { %2640 = vst [vmem:[#allocation13_spill] sm:$0xff] %v1690_v25  ;;  %2641 = vst [vmem:[#allocation14_spill] sm:$0xff] %v1692_v26  ;;  %vm289_vm11 = vcmp.eq.f32.partialorder %v1570_v50, %v1690_v25  ;;  %vm290_vm12 = vcmp.eq.f32.partialorder %v1566_v49, %v1692_v26  ;;  %v1700_v30 = vcvt.s32.f32 %v411_v27  ;;  %v1702_v31 = vcvt.s32.f32 %v425_v29 }
 0x185   :  { %v1705_v32 = vsel %vm289_vm11, %v1516_v23, 128  ;;  %v1708_v35 = vsel %vm290_vm12, %v1516_v23, 128  ;;  %v312_v26 = vand.u32 65535, %v1604_v57  ;;  %v340_v25 = vand.u32 65535, %v1621_v63 }
 0x186   :  { %414 = vmin.xlane.f32.xlu1 %v1700_v30  ;;  %428 = vmin.xlane.f32.xlu0 %v1702_v31  ;;  %v439_v38 = vshra.s32 %v1705_v32, 16  ;;  %v453_v41 = vshra.s32 %v1708_v35, 16  ;;  %v354_v57 = vand.u32 65535, %v1639_v6  ;;  %v382_v6 = vand.u32 65535, %v1661_v14 }
 0x187   :  { %v1712_v36 = vpop.xlane.xlu1 %270  ;;  %v1714_v37 = vpop.xlane.xlu0 %272  ;;  %v342_v8 = vcvt.s32.f32 %v340_v25  ;;  %v370_v25 = vcvt.s32.f32 %v368_v3  ;;  %v398_v3 = vcvt.s32.f32 %v396_v7  ;;  %v410_v14 = vand.u32 65535, %v1683_v22 }
 0x188   :  { %2642 = vst [vmem:[#allocation15_spill] sm:$0xff] %v1712_v36  ;;  %2643 = vst [vmem:[#allocation16_spill] sm:$0xff] %v1714_v37  ;;  %vm291_vm13 = vcmp.eq.f32.partialorder %v1576_v51, %v1712_v36  ;;  %vm292_vm14 = vcmp.eq.f32.partialorder %v1580_v52, %v1714_v37  ;;  %v1722_v42 = vcvt.s32.f32 %v439_v38  ;;  %v1724_v43 = vcvt.s32.f32 %v453_v41 }
 0x189   :  { %v1727_v44 = vsel %vm291_vm13, %v1516_v23, 128  ;;  %v1730_v58 = vsel %vm292_vm14, %v1516_v23, 128  ;;  %v438_v22 = vand.u32 65535, %v1705_v32  ;;  %v452_v24 = vand.u32 65535, %v1708_v35 }
 0x18a   :  { %442 = vmin.xlane.f32.xlu1 %v1722_v42  ;;  %456 = vmin.xlane.f32.xlu0 %v1724_v43  ;;  %v467_v10 = vshra.s32 %v1727_v44, 16  ;;  %v481_v11 = vshra.s32 %v1730_v58, 16  ;;  %v466_v32 = vand.u32 65535, %v1727_v44  ;;  %v480_v35 = vand.u32 65535, %v1730_v58 }
 0x18b   :  { %v1734_v0 = vpop.xlane.xlu1 %274  ;;  %v1736_v1 = vpop.xlane.xlu0 %276  ;;  %v454_v7 = vcvt.s32.f32 %v452_v24 }
 0x18c   :  { %2644 = vst [vmem:[#allocation17_spill] sm:$0xff] %v1734_v0  ;;  %2645 = vst [vmem:[#allocation18_spill] sm:$0xff] %v1736_v1  ;;  %vm293_vm15 = vcmp.eq.f32.partialorder %v1586_v53, %v1734_v0  ;;  %vm294_vm0 = vcmp.eq.f32.partialorder %v1590_v54, %v1736_v1  ;;  %v1744_v18 = vcvt.s32.f32 %v467_v10  ;;  %v1746_v19 = vcvt.s32.f32 %v481_v11 }
 0x18d   :  { %v1749_v27 = vsel %vm293_vm15, %v1516_v23, 128  ;;  %v1752_v29 = vsel %vm294_vm0, %v1516_v23, 128 }
 0x18e   :  { %470 = vmin.xlane.f32.xlu1 %v1744_v18  ;;  %484 = vmin.xlane.f32.xlu0 %v1746_v19  ;;  %v495_v41 = vshra.s32 %v1749_v27, 16  ;;  %v509_v1 = vshra.s32 %v1752_v29, 16  ;;  %v494_v44 = vand.u32 65535, %v1749_v27  ;;  %v508_v58 = vand.u32 65535, %v1752_v29 }
 0x18f   :  { %v1756_v38 = vpop.xlane.xlu1 %278 }
 0x190   :  { %2646 = vst [vmem:[#allocation19_spill] sm:$0xff] %v1756_v38  ;;  %vm295_vm1 = vcmp.eq.f32.partialorder %v1596_v55, %v1756_v38  ;;  %v1762_v10 = vcvt.s32.f32 %v495_v41  ;;  %v1764_v11 = vcvt.s32.f32 %v509_v1  ;;  %v314_v41 = vcvt.s32.f32 %v312_v26 }
 0x191   :  { %v1767_v0 = vsel %vm295_vm1, %v1516_v23, 128  ;;  %v326_v1 = vand.u32 65535, %v1618_v62  ;;  %v356_v26 = vcvt.s32.f32 %v354_v57 }
 0x192   :  { %v523_v37 = vshra.s32 %v1767_v0, 16  ;;  %498 = vmin.xlane.f32.xlu1 %v1762_v10  ;;  %512 = vmin.xlane.f32.xlu0 %v1764_v11  ;;  %v522_v27 = vand.u32 65535, %v1767_v0 }
 0x193   :  { %v328_v9 = vcvt.s32.f32 %v326_v1 }
 0x194   :  { %v1772_v36 = vcvt.s32.f32 %v523_v37 }
 0x196   :  { %526 = vmin.xlane.f32.xlu1 %v1772_v36 }
 0x203   :  { %v1776_v38 = vpop.xlane.xlu0 %316 }
 0x204   :  { %vm318_vm2 = vcmp.eq.f32.partialorder %v1615_v61, %v1776_v38  ;;  %v323_v0 = vcvt.f32.s32 %v1776_v38 }
 0x205   :  { %v319_v17 = vsel %vm318_vm2, %v314_v41, inf  ;;  %v384_v41 = vcvt.s32.f32 %v382_v6  ;;  %v440_v6 = vcvt.s32.f32 %v438_v22 }
 0x206   :  { %320 = vmin.xlane.f32.xlu0 %v319_v17  ;;  %v324_v24 = vshll.u32 %v323_v0, 16 }
 0x207   :  { %v1782_v16 = vpop.xlane.xlu1 %330  ;;  %v1784_v37 = vpop.xlane.xlu0 %344 }
 0x208   :  { %vm332_vm3 = vcmp.eq.f32.partialorder %v1634_v4, %v1782_v16  ;;  %vm346_vm4 = vcmp.eq.f32.partialorder %v1636_v5, %v1784_v37  ;;  %v337_v22 = vcvt.f32.s32 %v1782_v16 }
 0x209   :  { %v333_v62 = vsel %vm332_vm3, %v328_v9, inf  ;;  %v347_v61 = vsel %vm346_vm4, %v342_v8, inf }
 0x20a   :  { %334 = vmin.xlane.f32.xlu1 %v333_v62  ;;  %348 = vmin.xlane.f32.xlu0 %v347_v61  ;;  %v412_v62 = vcvt.s32.f32 %v410_v14  ;;  %v426_v61 = vcvt.s32.f32 %v424_v15 }
 0x20b   :  { %v1792_v63 = vpop.xlane.xlu1 %358  ;;  %v1794_v17 = vpop.xlane.xlu0 %372 }
 0x20c   :  { %vm360_vm5 = vcmp.eq.f32.partialorder %v1656_v12, %v1792_v63  ;;  %vm374_vm6 = vcmp.eq.f32.partialorder %v1658_v13, %v1794_v17 }
 0x20d   :  { %v361_v4 = vsel %vm360_vm5, %v356_v26, inf  ;;  %v375_v5 = vsel %vm374_vm6, %v370_v25, inf }
 0x20e   :  { %362 = vmin.xlane.f32.xlu1 %v361_v4  ;;  %376 = vmin.xlane.f32.xlu0 %v375_v5 }
 0x20f   :  { %v1802_v8 = vpop.xlane.xlu1 %386  ;;  %v1804_v9 = vpop.xlane.xlu0 %400 }
 0x210   :  { %vm388_vm7 = vcmp.eq.f32.partialorder %v1678_v20, %v1802_v8  ;;  %vm402_vm8 = vcmp.eq.f32.partialorder %v1680_v21, %v1804_v9 }
 0x211   :  { %v389_v12 = vsel %vm388_vm7, %v384_v41, inf  ;;  %v403_v13 = vsel %vm402_vm8, %v398_v3, inf  ;;  %v468_v41 = vcvt.s32.f32 %v466_v32  ;;  %v482_v3 = vcvt.s32.f32 %v480_v35 }
 0x212   :  { %390 = vmin.xlane.f32.xlu1 %v389_v12  ;;  %404 = vmin.xlane.f32.xlu0 %v403_v13  ;;  %v496_v12 = vcvt.s32.f32 %v494_v44  ;;  %v510_v13 = vcvt.s32.f32 %v508_v58  ;;  %v379_v32 = vcvt.f32.s32 %v1794_v17  ;;  %v393_v17 = vcvt.f32.s32 %v1802_v8 }
 0x213   :  { %v1812_v1 = vpop.xlane.xlu1 %414  ;;  %v1814_v57 = vpop.xlane.xlu0 %428  ;;  %v407_v44 = vcvt.f32.s32 %v1804_v9 }
 0x214   :  { %vm416_vm9 = vcmp.eq.f32.partialorder %v1700_v30, %v1812_v1  ;;  %vm430_vm10 = vcmp.eq.f32.partialorder %v1702_v31, %v1814_v57  ;;  %v394_v9 = vshll.u32 %v393_v17, 16 }
 0x215   :  { %v417_v20 = vsel %vm416_vm9, %v412_v62, inf  ;;  %v431_v21 = vsel %vm430_vm10, %v426_v61, inf  ;;  %v524_v62 = vcvt.s32.f32 %v522_v27 }
 0x216   :  { %418 = vmin.xlane.f32.xlu1 %v417_v20  ;;  %432 = vmin.xlane.f32.xlu0 %v431_v21 }
 0x217   :  { %v1822_v26 = vpop.xlane.xlu1 %442  ;;  %v1824_v25 = vpop.xlane.xlu0 %456 }
 0x218   :  { %vm444_vm11 = vcmp.eq.f32.partialorder %v1722_v42, %v1822_v26  ;;  %vm458_vm12 = vcmp.eq.f32.partialorder %v1724_v43, %v1824_v25 }
 0x219   :  { %v445_v30 = vsel %vm444_vm11, %v440_v6, inf  ;;  %v459_v31 = vsel %vm458_vm12, %v454_v7, inf  ;;  %v338_v6 = vshll.u32 %v337_v22, 16  ;;  %v365_v7 = vcvt.f32.s32 %v1792_v63 }
 0x21a   :  { %446 = vmin.xlane.f32.xlu1 %v445_v30  ;;  %460 = vmin.xlane.f32.xlu0 %v459_v31 }
 0x21b   :  { %v1832_v4 = vpop.xlane.xlu1 %470  ;;  %v1834_v5 = vpop.xlane.xlu0 %484  ;;  %v366_v63 = vshll.u32 %v365_v7, 16 }
 0x21c   :  { %vm472_vm13 = vcmp.eq.f32.partialorder %v1744_v18, %v1832_v4  ;;  %vm486_vm14 = vcmp.eq.f32.partialorder %v1746_v19, %v1834_v5 }
 0x21d   :  { %v473_v42 = vsel %vm472_vm13, %v468_v41, inf  ;;  %v487_v43 = vsel %vm486_vm14, %v482_v3, inf  ;;  %v380_v3 = vshll.u32 %v379_v32, 16 }
 0x21e   :  { %474 = vmin.xlane.f32.xlu1 %v473_v42  ;;  %488 = vmin.xlane.f32.xlu0 %v487_v43 }
 0x21f   :  { %v1842_v14 = vpop.xlane.xlu1 %498  ;;  %v1844_v15 = vpop.xlane.xlu0 %512 }
 0x220   :  { %vm500_vm15 = vcmp.eq.f32.partialorder %v1762_v10, %v1842_v14  ;;  %vm514_vm0 = vcmp.eq.f32.partialorder %v1764_v11, %v1844_v15  ;;  %v351_v11 = vcvt.f32.s32 %v1784_v37 }
 0x221   :  { %v501_v18 = vsel %vm500_vm15, %v496_v12, inf  ;;  %v515_v19 = vsel %vm514_vm0, %v510_v13, inf }
 0x222   :  { %502 = vmin.xlane.f32.xlu1 %v501_v18  ;;  %516 = vmin.xlane.f32.xlu0 %v515_v19  ;;  %v352_v30 = vshll.u32 %v351_v11, 16  ;;  %v408_v18 = vshll.u32 %v407_v44, 16  ;;  %v421_v19 = vcvt.f32.s32 %v1812_v1 }
 0x223   :  { %v1851_v29 = vpop.xlane.xlu1 %526 }
 0x224   :  { %vm528_vm1 = vcmp.eq.f32.partialorder %v1772_v36, %v1851_v29 }
 0x225   :  { %v529_v61 = vsel %vm528_vm1, %v524_v62, inf  ;;  %v435_v62 = vcvt.f32.s32 %v1814_v57  ;;  %v422_v57 = vshll.u32 %v421_v19, 16 }
 0x226   :  { %530 = vmin.xlane.f32.xlu1 %v529_v61 }
 0x227   :  { %v436_v11 = vshll.u32 %v435_v62, 16 }
 0x293   :  { %v321_v10 = vpop.xlane.xlu0 %320 }
 0x294   :  { %v322_v20 = vcvt.f32.s32 %v321_v10 }
 0x296   :  { %v1858_v21 = vadd.s32 %v324_v24, %v322_v20  ;;  %v449_v20 = vcvt.f32.s32 %v1822_v26 }
 0x297   :  { %v335_v35 = vpop.xlane.xlu1 %334  ;;  %v349_v36 = vpop.xlane.xlu0 %348 }
 0x298   :  { %2647 = vst [vmem:[#allocation20_spill] sm:$0xff] %v1858_v21  ;;  %v336_v31 = vcvt.f32.s32 %v335_v35  ;;  %v350_v41 = vcvt.f32.s32 %v349_v36  ;;  %vm536_vm2 = vcmp.eq.s32.totalorder %v1516_v23, %v1858_v21 }
 0x299   :  { %v1865_v16 = vsel %vm536_vm2, -inf, %v1521_v28 }
 0x29a   :  { %v1867_v38 = vadd.s32 %v338_v6, %v336_v31  ;;  %v1869_v37 = vadd.s32 %v352_v30, %v350_v41  ;;  %568 = vmax.xlane.f32.xlu0 %v1865_v16  ;;  %v463_v6 = vcvt.f32.s32 %v1824_v25  ;;  %v450_v25 = vshll.u32 %v449_v20, 16 }
 0x29b   :  { %v363_v58 = vpop.xlane.xlu1 %362  ;;  %v377_v42 = vpop.xlane.xlu0 %376  ;;  %v477_v41 = vcvt.f32.s32 %v1832_v4 }
 0x29c   :  { %2648 = vst [vmem:[#allocation21_spill] sm:$0xff] %v1867_v38  ;;  %2649 = vst [vmem:[#allocation22_spill] sm:$0xff] %v1869_v37  ;;  %v364_v43 = vcvt.f32.s32 %v363_v58  ;;  %v378_v12 = vcvt.f32.s32 %v377_v42  ;;  %vm537_vm3 = vcmp.eq.s32.totalorder %v1516_v23, %v1867_v38  ;;  %vm538_vm4 = vcmp.eq.s32.totalorder %v1516_v23, %v1869_v37 }
 0x29d   :  { %v1879_v28 = vsel %vm537_vm3, -inf, %v1526_v33  ;;  %v1882_v13 = vsel %vm538_vm4, -inf, %v1530_v34  ;;  %v464_v31 = vshll.u32 %v463_v6, 16 }
 0x29e   :  { %v1884_v27 = vadd.s32 %v366_v63, %v364_v43  ;;  %v1886_v8 = vadd.s32 %v380_v3, %v378_v12  ;;  %570 = vmax.xlane.f32.xlu1 %v1879_v28  ;;  %572 = vmax.xlane.f32.xlu0 %v1882_v13  ;;  %v491_v63 = vcvt.f32.s32 %v1834_v5  ;;  %v478_v5 = vshll.u32 %v477_v41, 16 }
 0x29f   :  { %v391_v61 = vpop.xlane.xlu1 %390  ;;  %v405_v33 = vpop.xlane.xlu0 %404  ;;  %v505_v12 = vcvt.f32.s32 %v1842_v14 }
 0x2a0   :  { %2650 = vst [vmem:[#allocation23_spill] sm:$0xff] %v1884_v27  ;;  %2651 = vst [vmem:[#allocation24_spill] sm:$0xff] %v1886_v8  ;;  %v392_v0 = vcvt.f32.s32 %v391_v61  ;;  %v406_v22 = vcvt.f32.s32 %v405_v33  ;;  %vm539_vm5 = vcmp.eq.s32.totalorder %v1516_v23, %v1884_v27  ;;  %vm540_vm6 = vcmp.eq.s32.totalorder %v1516_v23, %v1886_v8 }
 0x2a1   :  { %v1897_v34 = vsel %vm539_vm5, -inf, %v1536_v39  ;;  %v1900_v10 = vsel %vm540_vm6, -inf, %v1540_v40  ;;  %v492_v43 = vshll.u32 %v491_v63, 16 }
 0x2a2   :  { %v1902_v24 = vadd.s32 %v394_v9, %v392_v0  ;;  %v1904_v1 = vadd.s32 %v408_v18, %v406_v22  ;;  %574 = vmax.xlane.f32.xlu1 %v1897_v34  ;;  %576 = vmax.xlane.f32.xlu0 %v1900_v10  ;;  %v519_v9 = vcvt.f32.s32 %v1844_v15  ;;  %v506_v15 = vshll.u32 %v505_v12, 16 }
 0x2a3   :  { %v419_v7 = vpop.xlane.xlu1 %418  ;;  %v433_v39 = vpop.xlane.xlu0 %432  ;;  %v533_v22 = vcvt.f32.s32 %v1851_v29 }
 0x2a4   :  { %2652 = vst [vmem:[#allocation25_spill] sm:$0xff] %v1902_v24  ;;  %2653 = vst [vmem:[#allocation26_spill] sm:$0xff] %v1904_v1  ;;  %v420_v32 = vcvt.f32.s32 %v419_v7  ;;  %v434_v35 = vcvt.f32.s32 %v433_v39  ;;  %vm541_vm7 = vcmp.eq.s32.totalorder %v1516_v23, %v1902_v24  ;;  %vm542_vm8 = vcmp.eq.s32.totalorder %v1516_v23, %v1904_v1 }
 0x2a5   :  { %v1915_v40 = vsel %vm541_vm7, -inf, %v1546_v45  ;;  %v1918_v36 = vsel %vm542_vm8, -inf, %v1550_v46  ;;  %v520_v0 = vshll.u32 %v519_v9, 16 }
 0x2a6   :  { %v1920_v30 = vadd.s32 %v422_v57, %v420_v32  ;;  %v1922_v26 = vadd.s32 %v436_v11, %v434_v35  ;;  %578 = vmax.xlane.f32.xlu1 %v1915_v40  ;;  %580 = vmax.xlane.f32.xlu0 %v1918_v36  ;;  %v534_v32 = vshll.u32 %v533_v22, 16 }
 0x2a7   :  { %v447_v3 = vpop.xlane.xlu1 %446  ;;  %v461_v45 = vpop.xlane.xlu0 %460 }
 0x2a8   :  { %2654 = vst [vmem:[#allocation27_spill] sm:$0xff] %v1920_v30  ;;  %2655 = vst [vmem:[#allocation28_spill] sm:$0xff] %v1922_v26  ;;  %v448_v17 = vcvt.f32.s32 %v447_v3  ;;  %v462_v44 = vcvt.f32.s32 %v461_v45  ;;  %vm543_vm9 = vcmp.eq.s32.totalorder %v1516_v23, %v1920_v30  ;;  %vm544_vm10 = vcmp.eq.s32.totalorder %v1516_v23, %v1922_v26 }
 0x2a9   :  { %v1933_v46 = vsel %vm543_vm9, -inf, %v1560_v48  ;;  %v1936_v58 = vsel %vm544_vm10, -inf, %v1556_v47 }
 0x2aa   :  { %v1938_v42 = vadd.s32 %v450_v25, %v448_v17  ;;  %v1940_v4 = vadd.s32 %v464_v31, %v462_v44  ;;  %582 = vmax.xlane.f32.xlu1 %v1933_v46  ;;  %584 = vmax.xlane.f32.xlu0 %v1936_v58 }
 0x2ab   :  { %v475_v18 = vpop.xlane.xlu1 %474  ;;  %v489_v48 = vpop.xlane.xlu0 %488 }
 0x2ac   :  { %2656 = vst [vmem:[#allocation29_spill] sm:$0xff] %v1938_v42  ;;  %2657 = vst [vmem:[#allocation30_spill] sm:$0xff] %v1940_v4  ;;  %v476_v19 = vcvt.f32.s32 %v475_v18  ;;  %v490_v62 = vcvt.f32.s32 %v489_v48  ;;  %vm545_vm11 = vcmp.eq.s32.totalorder %v1516_v23, %v1938_v42  ;;  %vm546_vm12 = vcmp.eq.s32.totalorder %v1516_v23, %v1940_v4 }
 0x2ad   :  { %v1951_v47 = vsel %vm545_vm11, -inf, %v1570_v50  ;;  %v1954_v61 = vsel %vm546_vm12, -inf, %v1566_v49 }
 0x2ae   :  { %v1956_v33 = vadd.s32 %v478_v5, %v476_v19  ;;  %v1958_v14 = vadd.s32 %v492_v43, %v490_v62  ;;  %586 = vmax.xlane.f32.xlu1 %v1951_v47  ;;  %588 = vmax.xlane.f32.xlu0 %v1954_v61 }
 0x2af   :  { %v503_v57 = vpop.xlane.xlu1 %502  ;;  %v517_v11 = vpop.xlane.xlu0 %516 }
 0x2b0   :  { %2658 = vst [vmem:[#allocation31_spill] sm:$0xff] %v1956_v33  ;;  %2659 = vst [vmem:[#allocation32_spill] sm:$0xff] %v1958_v14  ;;  %v504_v20 = vcvt.f32.s32 %v503_v57  ;;  %v518_v50 = vcvt.f32.s32 %v517_v11  ;;  %vm547_vm13 = vcmp.eq.s32.totalorder %v1516_v23, %v1956_v33  ;;  %vm548_vm14 = vcmp.eq.s32.totalorder %v1516_v23, %v1958_v14 }
 0x2b1   :  { %v1968_v49 = vsel %vm547_vm13, -inf, %v1576_v51  ;;  %v1971_v6 = vsel %vm548_vm14, -inf, %v1580_v52 }
 0x2b2   :  { %v1973_v7 = vadd.s32 %v506_v15, %v504_v20  ;;  %v1975_v39 = vadd.s32 %v520_v0, %v518_v50  ;;  %590 = vmax.xlane.f32.xlu1 %v1968_v49  ;;  %592 = vmax.xlane.f32.xlu0 %v1971_v6 }
 0x2b3   :  { %v531_v29 = vpop.xlane.xlu1 %530 }
 0x2b4   :  { %2660 = vst [vmem:[#allocation33_spill] sm:$0xff] %v1973_v7  ;;  %2661 = vst [vmem:[#allocation34_spill] sm:$0xff] %v1975_v39  ;;  %v532_v35 = vcvt.f32.s32 %v531_v29  ;;  %vm549_vm15 = vcmp.eq.s32.totalorder %v1516_v23, %v1973_v7  ;;  %vm550_vm0 = vcmp.eq.s32.totalorder %v1516_v23, %v1975_v39 }
 0x2b5   :  { %v1984_v51 = vsel %vm549_vm15, -inf, %v1586_v53  ;;  %v1987_v52 = vsel %vm550_vm0, -inf, %v1590_v54 }
 0x2b6   :  { %v1989_v25 = vadd.s32 %v534_v32, %v532_v35  ;;  %594 = vmax.xlane.f32.xlu1 %v1984_v51  ;;  %596 = vmax.xlane.f32.xlu0 %v1987_v52 }
 0x2b8   :  { %2662 = vst [vmem:[#allocation35_spill] sm:$0xff] %v1989_v25  ;;  %vm551_vm1 = vcmp.eq.s32.totalorder %v1516_v23, %v1989_v25 }
 0x2b9   :  { %v1996_v31 = vsel %vm551_vm1, -inf, %v1596_v55 }
 0x2ba   :  { %598 = vmax.xlane.f32.xlu1 %v1996_v31 }
 0x327   :  { %v1999_v41 = vpop.xlane.xlu0 %568 }
 0x328   :  { %vm600_vm2 = vcmp.eq.f32.partialorder %v1865_v16, %v1999_v41 }
 0x329   :  { %v2004_v53 = vsel %vm600_vm2, %v1516_v23, 128 }
 0x32a   :  { %v633_v54 = vshra.s32 %v2004_v53, 16 }
 0x32b   :  { %v2007_v63 = vpop.xlane.xlu1 %570  ;;  %v2009_v3 = vpop.xlane.xlu0 %572 }
 0x32c   :  { %vm601_vm3 = vcmp.eq.f32.partialorder %v1879_v28, %v2007_v63  ;;  %vm602_vm4 = vcmp.eq.f32.partialorder %v1882_v13, %v2009_v3  ;;  %v2021_v45 = vcvt.s32.f32 %v633_v54 }
 0x32d   :  { %v2016_v55 = vsel %vm601_vm3, %v1516_v23, 128  ;;  %v2019_v16 = vsel %vm602_vm4, %v1516_v23, 128 }
 0x32e   :  { %v647_v17 = vshra.s32 %v2016_v55, 16  ;;  %v661_v44 = vshra.s32 %v2019_v16, 16  ;;  %636 = vmin.xlane.f32.xlu0 %v2021_v45  ;;  %v660_v21 = vand.u32 65535, %v2019_v16 }
 0x32f   :  { %v2026_v5 = vpop.xlane.xlu1 %574  ;;  %v2028_v28 = vpop.xlane.xlu0 %576 }
 0x330   :  { %vm603_vm5 = vcmp.eq.f32.partialorder %v1897_v34, %v2026_v5  ;;  %vm604_vm6 = vcmp.eq.f32.partialorder %v1900_v10, %v2028_v28  ;;  %v2040_v12 = vcvt.s32.f32 %v647_v17  ;;  %v2042_v9 = vcvt.s32.f32 %v661_v44 }
 0x331   :  { %v2035_v13 = vsel %vm603_vm5, %v1516_v23, 128  ;;  %v2038_v43 = vsel %vm604_vm6, %v1516_v23, 128 }
 0x332   :  { %v675_v18 = vshra.s32 %v2035_v13, 16  ;;  %v689_v34 = vshra.s32 %v2038_v43, 16  ;;  %650 = vmin.xlane.f32.xlu1 %v2040_v12  ;;  %664 = vmin.xlane.f32.xlu0 %v2042_v9 }
 0x333   :  { %v2045_v48 = vpop.xlane.xlu1 %578  ;;  %v2047_v19 = vpop.xlane.xlu0 %580 }
 0x334   :  { %vm605_vm7 = vcmp.eq.f32.partialorder %v1915_v40, %v2045_v48  ;;  %vm606_vm8 = vcmp.eq.f32.partialorder %v1918_v36, %v2047_v19  ;;  %v2062_v15 = vcvt.s32.f32 %v675_v18  ;;  %v2064_v0 = vcvt.s32.f32 %v689_v34 }
 0x335   :  { %v2057_v10 = vsel %vm605_vm7, %v1516_v23, 128  ;;  %v2060_v62 = vsel %vm606_vm8, %v1516_v23, 128 }
 0x336   :  { %v703_v22 = vshra.s32 %v2057_v10, 16  ;;  %v717_v40 = vshra.s32 %v2060_v62, 16  ;;  %678 = vmin.xlane.f32.xlu1 %v2062_v15  ;;  %692 = vmin.xlane.f32.xlu0 %v2064_v0 }
 0x337   :  { %v2067_v57 = vpop.xlane.xlu1 %582  ;;  %v2069_v11 = vpop.xlane.xlu0 %584 }
 0x338   :  { %vm607_vm9 = vcmp.eq.f32.partialorder %v1933_v46, %v2067_v57  ;;  %vm608_vm10 = vcmp.eq.f32.partialorder %v1936_v58, %v2069_v11  ;;  %v2084_v50 = vcvt.s32.f32 %v703_v22  ;;  %v2086_v29 = vcvt.s32.f32 %v717_v40 }
 0x339   :  { %v2079_v36 = vsel %vm607_vm9, %v1516_v23, 128  ;;  %v2082_v20 = vsel %vm608_vm10, %v1516_v23, 128 }
 0x33a   :  { %v731_v54 = vshra.s32 %v2079_v36, 16  ;;  %v745_v46 = vshra.s32 %v2082_v20, 16  ;;  %706 = vmin.xlane.f32.xlu1 %v2084_v50  ;;  %720 = vmin.xlane.f32.xlu0 %v2086_v29 }
 0x33b   :  { %v2088_v32 = vpop.xlane.xlu1 %586  ;;  %v2090_v35 = vpop.xlane.xlu0 %588 }
 0x33c   :  { %vm609_vm11 = vcmp.eq.f32.partialorder %v1951_v47, %v2088_v32  ;;  %vm610_vm12 = vcmp.eq.f32.partialorder %v1954_v61, %v2090_v35  ;;  %v2100_v58 = vcvt.s32.f32 %v731_v54  ;;  %v2105_v44 = vcvt.s32.f32 %v745_v46 }
 0x33d   :  { %v2103_v17 = vsel %vm609_vm11, %v1516_v23, 128  ;;  %v2112_v22 = vsel %vm610_vm12, %v1516_v23, 128 }
 0x33e   :  { %734 = vmin.xlane.f32.xlu1 %v2100_v58  ;;  %748 = vmin.xlane.f32.xlu0 %v2105_v44  ;;  %v759_v47 = vshra.s32 %v2103_v17, 16  ;;  %v773_v61 = vshra.s32 %v2112_v22, 16 }
 0x33f   :  { %v2107_v18 = vpop.xlane.xlu1 %590  ;;  %v2109_v34 = vpop.xlane.xlu0 %592 }
 0x340   :  { %vm611_vm13 = vcmp.eq.f32.partialorder %v1968_v49, %v2107_v18  ;;  %vm612_vm14 = vcmp.eq.f32.partialorder %v1971_v6, %v2109_v34  ;;  %v2129_v25 = vcvt.s32.f32 %v759_v47  ;;  %v2136_v6 = vcvt.s32.f32 %v773_v61 }
 0x341   :  { %v2127_v46 = vsel %vm611_vm13, %v1516_v23, 128  ;;  %v2134_v49 = vsel %vm612_vm14, %v1516_v23, 128 }
 0x342   :  { %762 = vmin.xlane.f32.xlu1 %v2129_v25  ;;  %776 = vmin.xlane.f32.xlu0 %v2136_v6  ;;  %v787_v47 = vshra.s32 %v2127_v46, 16  ;;  %v801_v61 = vshra.s32 %v2134_v49, 16 }
 0x343   :  { %v2122_v40 = vpop.xlane.xlu1 %594  ;;  %v2124_v54 = vpop.xlane.xlu0 %596 }
 0x344   :  { %vm613_vm15 = vcmp.eq.f32.partialorder %v1984_v51, %v2122_v40  ;;  %vm614_vm0 = vcmp.eq.f32.partialorder %v1987_v52, %v2124_v54  ;;  %v2154_v7 = vcvt.s32.f32 %v787_v47  ;;  %v2159_v1 = vcvt.s32.f32 %v801_v61 }
 0x345   :  { %v2143_v39 = vsel %vm613_vm15, %v1516_v23, 128  ;;  %v2149_v51 = vsel %vm614_vm0, %v1516_v23, 128  ;;  %v632_v61 = vand.u32 65535, %v2004_v53 }
 0x346   :  { %v815_v24 = vshra.s32 %v2143_v39, 16  ;;  %790 = vmin.xlane.f32.xlu1 %v2154_v7  ;;  %v829_v14 = vshra.s32 %v2149_v51, 16  ;;  %804 = vmin.xlane.f32.xlu0 %v2159_v1 }
 0x347   :  { %v2146_v30 = vpop.xlane.xlu1 %598  ;;  %v634_v27 = vcvt.s32.f32 %v632_v61 }
 0x348   :  { %2663 = vst [vmem:[#allocation36_spill] sm:$0xff] %v2146_v30  ;;  %vm615_vm1 = vcmp.eq.f32.partialorder %v1996_v31, %v2146_v30  ;;  %v2166_v8 = vcvt.s32.f32 %v815_v24  ;;  %v2168_v31 = vcvt.s32.f32 %v829_v14  ;;  %v646_v24 = vand.u32 65535, %v2016_v55 }
 0x349   :  { %v2157_v52 = vsel %vm615_vm1, %v1516_v23, 128 }
 0x34a   :  { %v843_v33 = vshra.s32 %v2157_v52, 16  ;;  %818 = vmin.xlane.f32.xlu1 %v2166_v8  ;;  %832 = vmin.xlane.f32.xlu0 %v2168_v31  ;;  %v648_v37 = vcvt.s32.f32 %v646_v24 }
 0x34c   :  { %v2171_v47 = vcvt.s32.f32 %v843_v33 }
 0x34e   :  { %846 = vmin.xlane.f32.xlu1 %v2171_v47 }
 0x3bb   :  { %v2176_v4 = vpop.xlane.xlu0 %636 }
 0x3bc   :  { %2664 = vst [vmem:[#allocation37_spill] sm:$0xff] %v2176_v4  ;;  %vm638_vm2 = vcmp.eq.f32.partialorder %v2021_v45, %v2176_v4 }
 0x3bd   :  { %v639_v14 = vsel %vm638_vm2, %v634_v27, inf  ;;  %v744_v27 = vand.u32 65535, %v2082_v20  ;;  %v772_v20 = vand.u32 65535, %v2112_v22  ;;  %vm1000_vm2 = vcmp.eq.s32.totalorder %v1516_v23, 0 }
 0x3be   :  { %640 = vmin.xlane.f32.xlu0 %v639_v14 }
 0x3bf   :  { %v2181_v42 = vpop.xlane.xlu1 %650  ;;  %v2183_v33 = vpop.xlane.xlu0 %664  ;;  %v746_v24 = vcvt.s32.f32 %v744_v27  ;;  %v674_v27 = vand.u32 65535, %v2035_v13  ;;  %v786_v13 = vand.u32 65535, %v2127_v46  ;;  %v702_v46 = vand.u32 65535, %v2057_v10 }
 0x3c0   :  { %2665 = vst [vmem:[#allocation38_spill] sm:$0xff] %v2181_v42  ;;  %vm652_vm3 = vcmp.eq.f32.partialorder %v2040_v12, %v2181_v42  ;;  %vm666_vm5 = vcmp.eq.f32.partialorder %v2042_v9, %v2183_v33  ;;  %v662_v12 = vcvt.s32.f32 %v660_v21  ;;  %v774_v21 = vcvt.s32.f32 %v772_v20 }
 0x3c1   :  { %v653_v26 = vsel %vm652_vm3, %v648_v37, inf  ;;  %v758_v37 = vand.u32 65535, %v2103_v17  ;;  %v688_v9 = vand.u32 65535, %v2038_v43  ;;  %v800_v43 = vand.u32 65535, %v2134_v49 }
 0x3c2   :  { %654 = vmin.xlane.f32.xlu1 %v653_v26  ;;  %v667_v16 = vsel %vm666_vm5, %v662_v12, inf  ;;  %v716_v12 = vand.u32 65535, %v2060_v62  ;;  %v704_v20 = vcvt.s32.f32 %v702_v46  ;;  %v814_v49 = vand.u32 65535, %v2143_v39 }
 0x3c3   :  { %v2187_v53 = vpop.xlane.xlu1 %678  ;;  %v2189_v61 = vpop.xlane.xlu0 %692  ;;  %v760_v4 = vcvt.s32.f32 %v758_v37  ;;  %v828_v62 = vand.u32 65535, %v2149_v51  ;;  %v904_v51 = vsub.f32 %v1999_v41, %v1599_v56  ;;  %v857_v41 = vsub.f32 %v1607_v59, %v1607_v59 }
 0x3c4   :  { %vm680_vm8 = vcmp.eq.f32.partialorder %v2062_v15, %v2187_v53  ;;  %vm694_vm9 = vcmp.eq.f32.partialorder %v2064_v0, %v2189_v61  ;;  %v690_v15 = vcvt.s32.f32 %v688_v9  ;;  %v802_v0 = vcvt.s32.f32 %v800_v43 }
 0x3c5   :  { %vm1049_vm3 = vcmp.eq.s32.totalorder %v1516_v23, 1 }
 0x3c6   :  { %v695_v37 = vsel %vm694_vm9, %v690_v15, inf }
 0x3c7   :  { %v2191_v38 = vpop.xlane.xlu1 %706  ;;  %v2193_v45 = vpop.xlane.xlu0 %720 }
 0x3c8   :  { %vm708_vm12 = vcmp.eq.f32.partialorder %v2084_v50, %v2191_v38  ;;  %vm722_vm13 = vcmp.eq.f32.partialorder %v2086_v29, %v2193_v45  ;;  %v816_v50 = vcvt.s32.f32 %v814_v49  ;;  %v830_v29 = vcvt.s32.f32 %v828_v62 }
 0x3c9   :  { %v709_v10 = vsel %vm708_vm12, %v704_v20, inf }
 0x3cb   :  { %v2196_v55 = vpop.xlane.xlu1 %734  ;;  %v2198_v14 = vpop.xlane.xlu0 %748 }
 0x3cc   :  { %vm750_vm4 = vcmp.eq.f32.partialorder %v2105_v44, %v2198_v14  ;;  %v676_v44 = vcvt.s32.f32 %v674_v27  ;;  %vm736_vm0 = vcmp.eq.f32.partialorder %v2100_v58, %v2196_v55 }
 0x3cd   :  { %v751_v26 = vsel %vm750_vm4, %v746_v24, inf }
 0x3ce   :  { %752 = vmin.xlane.f32.xlu0 %v751_v26 }
 0x3cf   :  { %v2207_v42 = vpop.xlane.xlu1 %762  ;;  %v2210_v30 = vpop.xlane.xlu0 %776 }
 0x3d0   :  { %vm764_vm6 = vcmp.eq.f32.partialorder %v2129_v25, %v2207_v42  ;;  %vm778_vm7 = vcmp.eq.f32.partialorder %v2136_v6, %v2210_v30  ;;  %v681_v25 = vsel %vm680_vm8, %v676_v44, inf  ;;  %v788_v6 = vcvt.s32.f32 %v786_v13 }
 0x3d1   :  { %v765_v17 = vsel %vm764_vm6, %v760_v4, inf  ;;  %v779_v24 = vsel %vm778_vm7, %v774_v21, inf  ;;  %v842_v44 = vand.u32 65535, %v2157_v52 }
 0x3d2   :  { %668 = vmin.xlane.f32.xlu0 %v667_v16  ;;  %766 = vmin.xlane.f32.xlu1 %v765_v17  ;;  %v730_v17 = vand.u32 65535, %v2079_v36 }
 0x3d3   :  { %v2220_v22 = vpop.xlane.xlu1 %790  ;;  %v2224_v4 = vpop.xlane.xlu0 %804  ;;  %v844_v58 = vcvt.s32.f32 %v842_v44 }
 0x3d4   :  { %vm792_vm10 = vcmp.eq.f32.partialorder %v2154_v7, %v2220_v22  ;;  %vm806_vm11 = vcmp.eq.f32.partialorder %v2159_v1, %v2224_v4  ;;  %v718_v1 = vcvt.s32.f32 %v716_v12 }
 0x3d5   :  { %v793_v26 = vsel %vm792_vm10, %v788_v6, inf  ;;  %v807_v27 = vsel %vm806_vm11, %v802_v0, inf  ;;  %v874_v6 = vmul.f32 1.442695, %v857_v41  ;;  %v2666_v0 = vld [vmem:[#allocation8_spill] sm:$0xff] }
 0x3d6   :  { %780 = vmin.xlane.f32.xlu0 %v779_v24  ;;  %682 = vmin.xlane.f32.xlu1 %v681_v25  ;;  %v723_v21 = vsel %vm722_vm13, %v718_v1, inf  ;;  %v856_v24 = vsub.f32 %v1599_v56, %v1599_v56  ;;  %v905_v25 = vsub.f32 %v2007_v63, %v1607_v59  ;;  %v906_v56 = vsub.f32 %v2009_v3, %v1609_v60 }
 0x3d7   :  { %v2235_v7 = vpop.xlane.xlu1 %818  ;;  %v2240_v16 = vpop.xlane.xlu0 %832  ;;  %v907_v63 = vsub.f32 %v2026_v5, %v1626_v2  ;;  %v859_v59 = vsub.f32 %v1626_v2, %v1626_v2  ;;  %v908_v3 = vsub.f32 %v2028_v28, %v2666_v0 }
 0x3d8   :  { %vm820_vm14 = vcmp.eq.f32.partialorder %v2166_v8, %v2235_v7  ;;  %vm834_vm15 = vcmp.eq.f32.partialorder %v2168_v31, %v2240_v16  ;;  %v732_v8 = vcvt.s32.f32 %v730_v17  ;;  %v920_v31 = vmul.f32 1.442695, %v904_v51 }
 0x3d9   :  { %v821_v39 = vsel %vm820_vm14, %v816_v50, inf  ;;  %v835_v36 = vsel %vm834_vm15, %v830_v29, inf  ;;  %v872_v52 = vmul.f32 1.442695, %v856_v24  ;;  %v922_v43 = vmul.f32 1.442695, %v905_v25 }
 0x3da   :  { %696 = vmin.xlane.f32.xlu0 %v695_v37  ;;  %794 = vmin.xlane.f32.xlu1 %v793_v26  ;;  %v737_v13 = vsel %vm736_vm0, %v732_v8, inf  ;;  %1274 = vpow2.f32 %v920_v31  ;;  %v924_v46 = vmul.f32 1.442695, %v906_v56  ;;  %v926_v26 = vmul.f32 1.442695, %v907_v63 }
 0x3db   :  { %v2250_v9 = vpop.xlane.xlu1 %846  ;;  %1276 = vpow2.f32 %v872_v52  ;;  %v878_v20 = vmul.f32 1.442695, %v859_v59  ;;  %v928_v5 = vmul.f32 1.442695, %v908_v3 }
 0x3dc   :  { %vm848_vm1 = vcmp.eq.f32.partialorder %v2171_v47, %v2250_v9  ;;  %v858_v47 = vsub.f32 %v1609_v60, %v1609_v60  ;;  %1278 = vpow2.f32 %v922_v43  ;;  %v860_v60 = vsub.f32 %v2666_v0, %v2666_v0 }
 0x3dd   :  { %v849_v15 = vsel %vm848_vm1, %v844_v58, inf  ;;  %1280 = vpow2.f32 %v874_v6 }
 0x3de   :  { %808 = vmin.xlane.f32.xlu0 %v807_v27  ;;  %710 = vmin.xlane.f32.xlu1 %v709_v10  ;;  %v876_v37 = vmul.f32 1.442695, %v858_v47  ;;  %1282 = vpow2.f32 %v924_v46  ;;  %v2667_v27 = vld [vmem:[#allocation9_spill] sm:$0xff]  ;;  %v880_v62 = vmul.f32 1.442695, %v860_v60 }
 0x3df   :  { %v909_v10 = vsub.f32 %v2045_v48, %v2667_v27  ;;  %v861_v28 = vsub.f32 %v2667_v27, %v2667_v27 }
 0x3e0   :  { %1284 = vpow2.f32 %v876_v37 }
 0x3e1   :  { %1286 = vpow2.f32 %v926_v26  ;;  %v930_v17 = vmul.f32 1.442695, %v909_v10  ;;  %v882_v48 = vmul.f32 1.442695, %v861_v28  ;;  %v2671_v26 = vld [vmem:[#allocation13_spill] sm:$0xff]  ;;  %v2672_v10 = vld [vmem:[#allocation14_spill] sm:$0xff] }
 0x3e2   :  { %724 = vmin.xlane.f32.xlu0 %v723_v21  ;;  %822 = vmin.xlane.f32.xlu1 %v821_v39  ;;  %1288 = vpow2.f32 %v878_v20  ;;  %v2668_v21 = vld [vmem:[#allocation10_spill] sm:$0xff]  ;;  %v913_v0 = vsub.f32 %v2088_v32, %v2671_v26  ;;  %v865_v20 = vsub.f32 %v2671_v26, %v2671_v26 }
 0x3e3   :  { %1290 = vpow2.f32 %v928_v5  ;;  %v910_v39 = vsub.f32 %v2047_v19, %v2668_v21  ;;  %v862_v44 = vsub.f32 %v2668_v21, %v2668_v21 }
 0x3e4   :  { %v2273_v12 = vpop.eup %1274  ;;  %v938_v32 = vmul.f32 1.442695, %v913_v0  ;;  %v890_v21 = vmul.f32 1.442695, %v865_v20 }
 0x3e5   :  { %v1277_v49 = vpop.eup %1276  ;;  %v884_v31 = vmul.f32 1.442695, %v862_v44 }
 0x3e6   :  { %836 = vmin.xlane.f32.xlu0 %v835_v36  ;;  %738 = vmin.xlane.f32.xlu1 %v737_v13  ;;  %v952_v2 = vadd.f32 %v1277_v49, %v2273_v12  ;;  %v2280_v1 = vpop.eup %1278  ;;  %v932_v36 = vmul.f32 1.442695, %v910_v39  ;;  %v2669_v13 = vld [vmem:[#allocation11_spill] sm:$0xff] }
 0x3e7   :  { %v1281_v50 = vpop.eup %1280  ;;  %v911_v24 = vsub.f32 %v2067_v57, %v2669_v13  ;;  %v863_v25 = vsub.f32 %v2669_v13, %v2669_v13  ;;  %v2673_v13 = vld [vmem:[#allocation15_spill] sm:$0xff] }
 0x3e8   :  { %1292 = vrcp.f32 %v952_v2  ;;  %v953_v29 = vadd.f32 %v1281_v50, %v2280_v1  ;;  %v2287_v8 = vpop.eup %1282  ;;  %v866_v2 = vsub.f32 %v2672_v10, %v2672_v10 }
 0x3e9   :  { %1294 = vpow2.f32 %v880_v62  ;;  %v934_v43 = vmul.f32 1.442695, %v911_v24  ;;  %v886_v47 = vmul.f32 1.442695, %v863_v25  ;;  %v914_v62 = vsub.f32 %v2090_v35, %v2672_v10  ;;  %v2675_v10 = vld [vmem:[#allocation17_spill] sm:$0xff] }
 0x3ea   :  { %850 = vmin.xlane.f32.xlu1 %v849_v15  ;;  %v2291_v51 = vpop.eup %1284  ;;  %1296 = vpow2.f32 %v930_v17  ;;  %v2670_v15 = vld [vmem:[#allocation12_spill] sm:$0xff]  ;;  %v892_v35 = vmul.f32 1.442695, %v866_v2  ;;  %v915_v24 = vsub.f32 %v2107_v18, %v2673_v13  ;;  %v917_v2 = vsub.f32 %v2122_v40, %v2675_v10 }
 0x3eb   :  { %1298 = vrcp.f32 %v953_v29  ;;  %v954_v19 = vadd.f32 %v2291_v51, %v2287_v8  ;;  %v2297_v58 = vpop.eup %1286  ;;  %v864_v52 = vsub.f32 %v2670_v15, %v2670_v15  ;;  %v912_v57 = vsub.f32 %v2069_v11, %v2670_v15 }
 0x3ec   :  { %1300 = vpow2.f32 %v882_v48  ;;  %v2303_v41 = vpop.eup %1288 }
 0x3ed   :  { %1302 = vpow2.f32 %v932_v36  ;;  %v955_v56 = vadd.f32 %v2303_v41, %v2297_v58  ;;  %v2309_v6 = vpop.eup %1290  ;;  %v888_v63 = vmul.f32 1.442695, %v864_v52  ;;  %v936_v59 = vmul.f32 1.442695, %v912_v57  ;;  %v2674_v57 = vld [vmem:[#allocation16_spill] sm:$0xff] }
 0x3ee   :  { %1304 = vrcp.f32 %v954_v19  ;;  %v940_v36 = vmul.f32 1.442695, %v914_v62 }
 0x3ef   :  { %1306 = vpow2.f32 %v884_v31 }
 0x3f0   :  { %1308 = vpow2.f32 %v934_v43 }
 0x3f1   :  { %1310 = vrcp.f32 %v955_v56  ;;  %v868_v56 = vsub.f32 %v2674_v57, %v2674_v57 }
 0x3f2   :  { %v1293_v46 = vpop.eup %1292  ;;  %1312 = vpow2.f32 %v886_v47  ;;  %v916_v47 = vsub.f32 %v2109_v34, %v2674_v57  ;;  %v2678_v57 = vld [vmem:[#allocation36_spill] sm:$0xff] }
 0x3f3   :  { %v2311_v37 = vpop.eup %1294  ;;  %v1001_v60 = vmul.f32 %v1293_v46, %v1277_v49  ;;  %1314 = vpow2.f32 %v888_v63  ;;  %v1050_v49 = vmul.f32 %v1293_v46, %v2273_v12 }
 0x3f4   :  { %v956_v11 = vadd.f32 %v2311_v37, %v2309_v6  ;;  %v2317_v3 = vpop.eup %1296  ;;  %1316 = vpow2.f32 %v936_v59 }
 0x3f5   :  { %v1299_v5 = vpop.eup %1298  ;;  %v1017_v39 = vsel %vm1000_vm2, %v1001_v60, 0.0  ;;  %v896_v60 = vmul.f32 1.442695, %v868_v56 }
 0x3f6   :  { %v2321_v27 = vpop.eup %1300  ;;  %1318 = vrcp.f32 %v956_v11  ;;  %v1002_v29 = vmul.f32 %v1299_v5, %v1281_v50  ;;  %v1066_v19 = vsel %vm1049_vm3, %v1050_v49, %v1017_v39  ;;  %v1051_v31 = vmul.f32 %v1299_v5, %v2280_v1 }
 0x3f7   :  { %v957_v28 = vadd.f32 %v2321_v27, %v2317_v3  ;;  %v2331_v17 = vpop.eup %1302  ;;  %1320 = vpow2.f32 %v938_v32  ;;  %v867_v50 = vsub.f32 %v2673_v13, %v2673_v13  ;;  %v942_v1 = vmul.f32 1.442695, %v915_v24 }
 0x3f8   :  { %v1305_v48 = vpop.eup %1304  ;;  %v1018_v15 = vsel %vm1000_vm2, %v1002_v29, 0.0  ;;  %v944_v5 = vmul.f32 1.442695, %v916_v47  ;;  %v2676_v29 = vld [vmem:[#allocation18_spill] sm:$0xff] }
 0x3f9   :  { %v2336_v44 = vpop.eup %1306  ;;  %1322 = vrcp.f32 %v957_v28  ;;  %v1003_v18 = vmul.f32 %v1305_v48, %v2291_v51  ;;  %v1067_v51 = vsel %vm1049_vm3, %v1051_v31, %v1018_v15  ;;  %v1052_v59 = vmul.f32 %v1305_v48, %v2287_v8 }
 0x3fa   :  { %v958_v12 = vadd.f32 %v2336_v44, %v2331_v17  ;;  %v2345_v25 = vpop.eup %1308  ;;  %1324 = vpow2.f32 %v890_v21  ;;  %v894_v0 = vmul.f32 1.442695, %v867_v50  ;;  %v870_v48 = vsub.f32 %v2676_v29, %v2676_v29 }
 0x3fb   :  { %v1311_v52 = vpop.eup %1310  ;;  %1326 = vpow2.f32 %v940_v36  ;;  %v1019_v11 = vsel %vm1000_vm2, %v1003_v18, 0.0 }
 0x3fc   :  { %v2352_v43 = vpop.eup %1312  ;;  %1328 = vrcp.f32 %v958_v12  ;;  %v1004_v34 = vmul.f32 %v1311_v52, %v2303_v41  ;;  %v1068_v32 = vsel %vm1049_vm3, %v1052_v59, %v1019_v11  ;;  %v1053_v62 = vmul.f32 %v1311_v52, %v2297_v58  ;;  %v2677_v52 = vld [vmem:[#allocation19_spill] sm:$0xff] }
 0x3fd   :  { %v2358_v46 = vpop.eup %1314  ;;  %v959_v63 = vadd.f32 %v2352_v43, %v2345_v25  ;;  %1330 = vpow2.f32 %v892_v35  ;;  %v869_v41 = vsub.f32 %v2675_v10, %v2675_v10  ;;  %v946_v58 = vmul.f32 1.442695, %v917_v2 }
 0x3fe   :  { %v2365_v26 = vpop.eup %1316  ;;  %1332 = vpow2.f32 %v942_v1  ;;  %v1020_v49 = vsel %vm1000_vm2, %v1004_v34, 0.0  ;;  %v918_v35 = vsub.f32 %v2124_v54, %v2676_v29  ;;  %v900_v15 = vmul.f32 1.442695, %v870_v48 }
 0x3ff   :  { %1334 = vrcp.f32 %v959_v63  ;;  %v960_v8 = vadd.f32 %v2365_v26, %v2358_v46  ;;  %v1069_v13 = vsel %vm1049_vm3, %v1053_v62, %v1020_v49  ;;  %v898_v12 = vmul.f32 1.442695, %v869_v41 }
 0x400   :  { %v1319_v20 = vpop.eup %1318  ;;  %1336 = vpow2.f32 %v894_v0  ;;  %v948_v18 = vmul.f32 1.442695, %v918_v35  ;;  %v919_v56 = vsub.f32 %v2678_v57, %v2677_v52 }
 0x401   :  { %v2377_v28 = vpop.eup %1320  ;;  %v1005_v40 = vmul.f32 %v1319_v20, %v2311_v37  ;;  %1338 = vpow2.f32 %v944_v5  ;;  %v1054_v37 = vmul.f32 %v1319_v20, %v2309_v6 }
 0x402   :  { %1340 = vrcp.f32 %v960_v8  ;;  %v950_v34 = vmul.f32 1.442695, %v919_v56 }
 0x403   :  { %v1323_v21 = vpop.eup %1322  ;;  %1342 = vpow2.f32 %v896_v60 }
 0x404   :  { %v2384_v39 = vpop.eup %1324  ;;  %v1006_v31 = vmul.f32 %v1323_v21, %v2321_v27  ;;  %1344 = vpow2.f32 %v946_v58  ;;  %v1055_v47 = vmul.f32 %v1323_v21, %v2317_v3  ;;  %v871_v27 = vsub.f32 %v2677_v52, %v2677_v52 }
 0x405   :  { %v961_v36 = vadd.f32 %v2384_v39, %v2377_v28  ;;  %v2395_v24 = vpop.eup %1326 }
 0x406   :  { %v1329_v54 = vpop.eup %1328  ;;  %v902_v10 = vmul.f32 1.442695, %v871_v27 }
 0x407   :  { %v1331_v50 = vpop.eup %1330  ;;  %1346 = vrcp.f32 %v961_v36  ;;  %v1007_v59 = vmul.f32 %v1329_v54, %v2336_v44  ;;  %v1056_v60 = vmul.f32 %v1329_v54, %v2331_v17 }
 0x408   :  { %v962_v6 = vadd.f32 %v1331_v50, %v2395_v24  ;;  %v2406_v63 = vpop.eup %1332  ;;  %1348 = vpow2.f32 %v898_v12 }
 0x409   :  { %v1335_v0 = vpop.eup %1334  ;;  %1350 = vpow2.f32 %v948_v18  ;;  %v1023_v2 = vsel %vm1000_vm2, %v1007_v59, 0.0 }
 0x40a   :  { %v1337_v11 = vpop.eup %1336  ;;  %1352 = vrcp.f32 %v962_v6  ;;  %v1008_v44 = vmul.f32 %v1335_v0, %v2352_v43  ;;  %v1072_v41 = vsel %vm1049_vm3, %v1056_v60, %v1023_v2  ;;  %v1057_v49 = vmul.f32 %v1335_v0, %v2345_v25 }
 0x40b   :  { %v963_v20 = vadd.f32 %v1337_v11, %v2406_v63  ;;  %v1339_v5 = vpop.eup %1338  ;;  %1354 = vpow2.f32 %v900_v15 }
 0x40c   :  { %v1341_v8 = vpop.eup %1340  ;;  %1356 = vpow2.f32 %v950_v34 }
 0x40d   :  { %1358 = vrcp.f32 %v963_v20  ;;  %v1009_v21 = vmul.f32 %v1341_v8, %v2358_v46  ;;  %v1058_v35 = vmul.f32 %v1341_v8, %v2365_v26 }
 0x40e   :  { %1360 = vpow2.f32 %v902_v10 }
 0x40f   :  { %v1025_v25 = vsel %vm1000_vm2, %v1009_v21, 0.0 }
 0x413   :  { %1098 = vxpose.xlu0.b32.start [1/16] (narrow) %v1066_v19, 8  ;;  %v1021_v19 = vsel %vm1000_vm2, %v1005_v40, 0.0  ;;  %v1024_v40 = vsel %vm1000_vm2, %v1008_v44, 0.0  ;;  %v2679_v44 = vld [vmem:[#allocation37_spill] sm:$0xff] }
 0x414   :  { %v1070_v1 = vsel %vm1049_vm3, %v1054_v37, %v1021_v19  ;;  %v1073_v58 = vsel %vm1049_vm3, %v1057_v49, %v1024_v40  ;;  %v1074_v19 = vsel %vm1049_vm3, %v1058_v35, %v1025_v25  ;;  %v643_v8 = vcvt.f32.s32 %v2679_v44 }
 0x416   :  { %v644_v40 = vshll.u32 %v643_v8, 16 }
 0x417   :  { %1099 = vxpose.xlu0.b32.cont [2/16] (narrow) %v1067_v51, 8  ;;  %v1022_v51 = vsel %vm1000_vm2, %v1006_v31, 0.0 }
 0x418   :  { %v1071_v3 = vsel %vm1049_vm3, %v1055_v47, %v1022_v51 }
 0x41b   :  { %1100 = vxpose.xlu0.b32.cont [3/16] (narrow) %v1068_v32, 8  ;;  %v1343_v32 = vpop.eup %1342 }
 0x41c   :  { %v964_v62 = vadd.f32 %v1343_v32, %v1339_v5  ;;  %v1345_v17 = vpop.eup %1344 }
 0x41d   :  { %v1347_v29 = vpop.eup %1346 }
 0x41e   :  { %v1349_v43 = vpop.eup %1348  ;;  %1362 = vrcp.f32 %v964_v62  ;;  %v1059_v31 = vmul.f32 %v1347_v29, %v2377_v28 }
 0x41f   :  { %1101 = vxpose.xlu0.b32.cont [4/16] (narrow) %v1069_v13, 8  ;;  %v965_v48 = vadd.f32 %v1349_v43, %v1345_v17  ;;  %v1351_v36 = vpop.eup %1350  ;;  %v1010_v13 = vmul.f32 %v1347_v29, %v2384_v39 }
 0x420   :  { %v1353_v37 = vpop.eup %1352 }
 0x421   :  { %v1355_v12 = vpop.eup %1354  ;;  %1364 = vrcp.f32 %v965_v48  ;;  %v1026_v26 = vsel %vm1000_vm2, %v1010_v13, 0.0  ;;  %v1011_v15 = vmul.f32 %v1353_v37, %v1331_v50  ;;  %v1060_v56 = vmul.f32 %v1353_v37, %v2395_v24 }
 0x422   :  { %v966_v46 = vadd.f32 %v1355_v12, %v1351_v36  ;;  %v1357_v54 = vpop.eup %1356  ;;  %v1075_v39 = vsel %vm1049_vm3, %v1059_v31, %v1026_v26 }
 0x423   :  { %1102 = vxpose.xlu0.b32.cont [5/16] (narrow) %v1070_v1, 8  ;;  %v1359_v18 = vpop.eup %1358  ;;  %v1027_v6 = vsel %vm1000_vm2, %v1011_v15, 0.0 }
 0x424   :  { %v1361_v52 = vpop.eup %1360  ;;  %1366 = vrcp.f32 %v966_v46  ;;  %v1012_v28 = vmul.f32 %v1359_v18, %v1337_v11  ;;  %v1076_v47 = vsel %vm1049_vm3, %v1060_v56, %v1027_v6  ;;  %v1061_v50 = vmul.f32 %v1359_v18, %v2406_v63 }
 0x425   :  { %v967_v57 = vadd.f32 %v1361_v52, %v1357_v54  ;;  %v755_v18 = vcvt.f32.s32 %v2198_v14  ;;  %v769_v6 = vcvt.f32.s32 %v2207_v42 }
 0x426   :  { %v1028_v27 = vsel %vm1000_vm2, %v1012_v28, 0.0 }
 0x427   :  { %1103 = vxpose.xlu0.b32.cont [6/16] (narrow) %v1071_v3, 8  ;;  %1368 = vrcp.f32 %v967_v57  ;;  %v1077_v24 = vsel %vm1049_vm3, %v1061_v50, %v1028_v27  ;;  %v671_v57 = vcvt.f32.s32 %v2183_v33  ;;  %v685_v33 = vcvt.f32.s32 %v2187_v53 }
 0x428   :  { %v1363_v1 = vpop.eup %1362 }
 0x429   :  { %v1013_v51 = vmul.f32 %v1363_v1, %v1343_v32  ;;  %v1062_v0 = vmul.f32 %v1363_v1, %v1339_v5  ;;  %v672_v27 = vshll.u32 %v671_v57, 16 }
 0x42b   :  { %1104 = vxpose.xlu0.b32.cont [7/16] (narrow) %v1072_v41, 8  ;;  %v1365_v59 = vpop.eup %1364  ;;  %v1029_v11 = vsel %vm1000_vm2, %v1013_v51, 0.0  ;;  %v783_v51 = vcvt.f32.s32 %v2210_v30 }
 0x42c   :  { %v1014_v34 = vmul.f32 %v1365_v59, %v1349_v43  ;;  %v1078_v3 = vsel %vm1049_vm3, %v1062_v0, %v1029_v11  ;;  %v1063_v63 = vmul.f32 %v1365_v59, %v1345_v17  ;;  %v2680_v43 = vld [vmem:[#allocation38_spill] sm:$0xff]  ;;  %v770_v0 = vshll.u32 %v769_v6, 16 }
 0x42d   :  { %v657_v48 = vcvt.f32.s32 %v2680_v43  ;;  %v825_v6 = vcvt.f32.s32 %v2235_v7 }
 0x42e   :  { %v1367_v20 = vpop.eup %1366  ;;  %v1030_v60 = vsel %vm1000_vm2, %v1014_v34, 0.0 }
 0x42f   :  { %1105 = vxpose.xlu0.b32.cont [8/16] (narrow) %v1073_v58, 8  ;;  %v1015_v10 = vmul.f32 %v1367_v20, %v1355_v12  ;;  %v1079_v5 = vsel %vm1049_vm3, %v1063_v63, %v1030_v60  ;;  %v1064_v32 = vmul.f32 %v1367_v20, %v1351_v36  ;;  %v2681_v36 = vld [vmem:[#allocation20_spill] sm:$0xff]  ;;  %v658_v46 = vshll.u32 %v657_v48, 16  ;;  %v2685_v60 = vld [vmem:[#allocation29_spill] sm:$0xff] }
 0x430   :  { %v1033_v25 = vsel %vm1000_vm2, %v2681_v36, 0  ;;  %v1042_v30 = vsel %vm1000_vm2, %v2685_v60, 0 }
 0x431   :  { %v1369_v2 = vpop.eup %1368  ;;  %v1031_v62 = vsel %vm1000_vm2, %v1015_v10, 0.0  ;;  %v699_v10 = vcvt.f32.s32 %v2189_v61 }
 0x432   :  { %v1016_v41 = vmul.f32 %v1369_v2, %v1361_v52  ;;  %v1080_v17 = vsel %vm1049_vm3, %v1064_v32, %v1031_v62  ;;  %v1065_v29 = vmul.f32 %v1369_v2, %v1357_v54  ;;  %v2682_v54 = vld [vmem:[#allocation21_spill] sm:$0xff]  ;;  %v784_v2 = vshll.u32 %v783_v51, 16  ;;  %v2690_v51 = vld [vmem:[#allocation32_spill] sm:$0xff] }
 0x433   :  { %1106 = vxpose.xlu0.b32.cont [9/16] (narrow) %v1074_v19, 8  ;;  %v1034_v26 = vsel %vm1000_vm2, %v2682_v54, 0  ;;  %v797_v32 = vcvt.f32.s32 %v2220_v22  ;;  %v700_v48 = vshll.u32 %v699_v10, 16  ;;  %v2688_v54 = vld [vmem:[#allocation24_spill] sm:$0xff] }
 0x434   :  { %v1032_v58 = vsel %vm1000_vm2, %v1016_v41, 0.0 }
 0x435   :  { %v1081_v37 = vsel %vm1049_vm3, %v1065_v29, %v1032_v58  ;;  %v2687_v29 = vld [vmem:[#allocation30_spill] sm:$0xff]  ;;  %v811_v58 = vcvt.f32.s32 %v2224_v4  ;;  %v1037_v4 = vsel %vm1000_vm2, %v2688_v54, 0 }
 0x436   :  { %v1043_v43 = vsel %vm1000_vm2, %v2687_v29, 0 }
 0x437   :  { %1107 = vxpose.xlu0.b32.cont [10/16] (narrow) %v1075_v39, 8  ;;  %v756_v39 = vshll.u32 %v755_v18, 16  ;;  %v727_v18 = vcvt.f32.s32 %v2193_v45  ;;  %v1045_v45 = vsel %vm1000_vm2, %v2690_v51, 0 }
 0x43b   :  { %1108 = vxpose.xlu0.b32.cont [11/16] (narrow) %v1076_v47, 8  ;;  %v2683_v47 = vld [vmem:[#allocation28_spill] sm:$0xff] }
 0x43c   :  { %v1041_v50 = vsel %vm1000_vm2, %v2683_v47, 0 }
 0x43f   :  { %1109 = vxpose.xlu0.b32.cont [12/16] (narrow) %v1077_v24, 8 }
 0x443   :  { %1110 = vxpose.xlu0.b32.cont [13/16] (narrow) %v1078_v3, 8  ;;  %v2684_v3 = vld [vmem:[#allocation22_spill] sm:$0xff] }
 0x444   :  { %v1035_v63 = vsel %vm1000_vm2, %v2684_v3, 0 }
 0x447   :  { %1111 = vxpose.xlu0.b32.cont [14/16] (narrow) %v1079_v5, 8  ;;  %v686_v5 = vshll.u32 %v685_v33, 16 }
 0x44b   :  { %v641_v49 = vpop.xlane.xlu0 %640  ;;  %1112 = vxpose.xlu0.b32.cont [15/16] (narrow) %v1080_v17, 8 }
 0x44c   :  { %v642_v21 = vcvt.f32.s32 %v641_v49 }
 0x44e   :  { %v645_v35 = vadd.s32 %v644_v40, %v642_v21  ;;  %v2686_v21 = vld [vmem:[#allocation23_spill] sm:$0xff] }
 0x44f   :  { %v655_v13 = vpop.xlane.xlu1 %654  ;;  %1113 = vxpose.xlu0.b32.end [16/16] (narrow) %v1081_v37, 8  ;;  %v1036_v61 = vsel %vm1000_vm2, %v2686_v21, 0 }
 0x450   :  { %v1082_v12 = vsel %vm1049_vm3, %v645_v35, %v1033_v25  ;;  %v656_v19 = vcvt.f32.s32 %v655_v13  ;;  %v713_v25 = vcvt.f32.s32 %v2191_v38  ;;  %v798_v13 = vshll.u32 %v797_v32, 16 }
 0x451   :  { %1131 = vxpose.xlu1.b32.start [1/16] (narrow) %v1082_v12, 8  ;;  %v812_v38 = vshll.u32 %v811_v58, 16  ;;  %v853_v58 = vcvt.f32.s32 %v2250_v9 }
 0x452   :  { %v659_v31 = vadd.s32 %v658_v46, %v656_v19 }
 0x454   :  { %v1083_v15 = vsel %vm1049_vm3, %v659_v31, %v1034_v26  ;;  %v2689_v26 = vld [vmem:[#allocation31_spill] sm:$0xff] }
 0x455   :  { %1132 = vxpose.xlu1.b32.cont [2/16] (narrow) %v1083_v15, 8  ;;  %v1044_v15 = vsel %vm1000_vm2, %v2689_v26, 0 }
 0x45b   :  { %v753_v52 = vpop.xlane.xlu0 %752 }
 0x45c   :  { %v754_v56 = vcvt.f32.s32 %v753_v52 }
 0x45e   :  { %v757_v28 = vadd.s32 %v756_v39, %v754_v56  ;;  %v714_v56 = vshll.u32 %v713_v25, 16  ;;  %v854_v25 = vshll.u32 %v853_v58, 16 }
 0x45f   :  { %v669_v1 = vpop.xlane.xlu0 %668  ;;  %v767_v59 = vpop.xlane.xlu1 %766 }
 0x460   :  { %v670_v24 = vcvt.f32.s32 %v669_v1  ;;  %v2486_v14 = vsel %vm1049_vm3, %v757_v28, %v1041_v50  ;;  %v768_v11 = vcvt.f32.s32 %v767_v59  ;;  %v728_v59 = vshll.u32 %v727_v18, 16 }
 0x462   :  { %v673_v42 = vadd.s32 %v672_v27, %v670_v24  ;;  %v771_v34 = vadd.s32 %v770_v0, %v768_v11  ;;  %v2691_v0 = vld [vmem:[#allocation25_spill] sm:$0xff] }
 0x463   :  { %v781_v20 = vpop.xlane.xlu0 %780  ;;  %v683_v44 = vpop.xlane.xlu1 %682  ;;  %v1038_v11 = vsel %vm1000_vm2, %v2691_v0, 0 }
 0x464   :  { %v782_v8 = vcvt.f32.s32 %v781_v20  ;;  %v1084_v53 = vsel %vm1049_vm3, %v673_v42, %v1035_v63  ;;  %v684_v62 = vcvt.f32.s32 %v683_v44  ;;  %v1091_v41 = vsel %vm1049_vm3, %v771_v34, %v1042_v30  ;;  %v2692_v30 = vld [vmem:[#allocation26_spill] sm:$0xff] }
 0x465   :  { %1133 = vxpose.xlu1.b32.cont [3/16] (narrow) %v1084_v53, 8  ;;  %v741_v42 = vcvt.f32.s32 %v2196_v55  ;;  %v826_v34 = vshll.u32 %v825_v6, 16  ;;  %v1039_v10 = vsel %vm1000_vm2, %v2692_v30, 0 }
 0x466   :  { %v785_v49 = vadd.s32 %v784_v2, %v782_v8  ;;  %v687_v40 = vadd.s32 %v686_v5, %v684_v62  ;;  %v2693_v8 = vld [vmem:[#allocation33_spill] sm:$0xff] }
 0x467   :  { %v697_v17 = vpop.xlane.xlu0 %696  ;;  %v795_v22 = vpop.xlane.xlu1 %794  ;;  %v1046_v55 = vsel %vm1000_vm2, %v2693_v8, 0  ;;  %v742_v53 = vshll.u32 %v741_v42, 16 }
 0x468   :  { %v698_v35 = vcvt.f32.s32 %v697_v17  ;;  %v1092_v36 = vsel %vm1049_vm3, %v785_v49, %v1043_v43  ;;  %v796_v37 = vcvt.f32.s32 %v795_v22  ;;  %v1085_v12 = vsel %vm1049_vm3, %v687_v40, %v1036_v61  ;;  %v2694_v49 = vld [vmem:[#allocation27_spill] sm:$0xff] }
 0x469   :  { %1134 = vxpose.xlu1.b32.cont [4/16] (narrow) %v1085_v12, 8  ;;  %v1040_v40 = vsel %vm1000_vm2, %v2694_v49, 0  ;;  %v839_v61 = vcvt.f32.s32 %v2240_v16 }
 0x46a   :  { %v701_v46 = vadd.s32 %v700_v48, %v698_v35  ;;  %v799_v19 = vadd.s32 %v798_v13, %v796_v37 }
 0x46b   :  { %v809_v31 = vpop.xlane.xlu0 %808  ;;  %v711_v52 = vpop.xlane.xlu1 %710  ;;  %v840_v48 = vshll.u32 %v839_v61, 16 }
 0x46c   :  { %v810_v57 = vcvt.f32.s32 %v809_v31  ;;  %v1086_v39 = vsel %vm1049_vm3, %v701_v46, %v1037_v4  ;;  %v712_v28 = vcvt.f32.s32 %v711_v52  ;;  %v1093_v1 = vsel %vm1049_vm3, %v799_v19, %v1044_v15 }
 0x46d   :  { %1135 = vxpose.xlu1.b32.cont [5/16] (narrow) %v1086_v39, 8 }
 0x46e   :  { %v813_v47 = vadd.s32 %v812_v38, %v810_v57  ;;  %v715_v50 = vadd.s32 %v714_v56, %v712_v28 }
 0x46f   :  { %v725_v27 = vpop.xlane.xlu0 %724  ;;  %v823_v24 = vpop.xlane.xlu1 %822 }
 0x470   :  { %v726_v33 = vcvt.f32.s32 %v725_v27  ;;  %v1094_v7 = vsel %vm1049_vm3, %v813_v47, %v1045_v45  ;;  %v824_v20 = vcvt.f32.s32 %v823_v24  ;;  %v1087_v3 = vsel %vm1049_vm3, %v715_v50, %v1038_v11 }
 0x471   :  { %1136 = vxpose.xlu1.b32.cont [6/16] (narrow) %v1087_v3, 8 }
 0x472   :  { %v729_v63 = vadd.s32 %v728_v59, %v726_v33  ;;  %v827_v60 = vadd.s32 %v826_v34, %v824_v20 }
 0x473   :  { %v739_v2 = vpop.xlane.xlu1 %738  ;;  %v837_v21 = vpop.xlane.xlu0 %836 }
 0x474   :  { %v1088_v44 = vsel %vm1049_vm3, %v729_v63, %v1039_v10  ;;  %v740_v5 = vcvt.f32.s32 %v739_v2  ;;  %v1095_v32 = vsel %vm1049_vm3, %v827_v60, %v1046_v55  ;;  %v838_v29 = vcvt.f32.s32 %v837_v21 }
 0x475   :  { %1137 = vxpose.xlu1.b32.cont [7/16] (narrow) %v1088_v44, 8 }
 0x476   :  { %v743_v62 = vadd.s32 %v742_v53, %v740_v5  ;;  %v841_v22 = vadd.s32 %v840_v48, %v838_v29 }
 0x477   :  { %v851_v43 = vpop.xlane.xlu1 %850 }
 0x478   :  { %v1089_v17 = vsel %vm1049_vm3, %v743_v62, %v1040_v40  ;;  %v852_v35 = vcvt.f32.s32 %v851_v43 }
 0x479   :  { %1138 = vxpose.xlu1.b32.cont [8/16] (narrow) %v1089_v17, 8 }
 0x47a   :  { %v855_v16 = vadd.s32 %v854_v25, %v852_v35 }
 0x47d   :  { %1139 = vxpose.xlu1.b32.cont [9/16] (narrow) %v2486_v14, 8 }
 0x481   :  { %1140 = vxpose.xlu1.b32.cont [10/16] (narrow) %v1091_v41, 8  ;;  %v2695_v41 = vld [vmem:[#allocation34_spill] sm:$0xff] }
 0x485   :  { %1141 = vxpose.xlu1.b32.cont [11/16] (narrow) %v1092_v36, 8  ;;  %v1047_v36 = vsel %vm1000_vm2, %v2695_v41, 0 }
 0x486   :  { %v1096_v13 = vsel %vm1049_vm3, %v841_v22, %v1047_v36 }
 0x489   :  { %1142 = vxpose.xlu1.b32.cont [12/16] (narrow) %v1093_v1, 8 }
 0x48d   :  { %1143 = vxpose.xlu1.b32.cont [13/16] (narrow) %v1094_v7, 8 }
 0x491   :  { %1144 = vxpose.xlu1.b32.cont [14/16] (narrow) %v1095_v32, 8 }
 0x493   :  { %v1114_v14 = vpop.trf.xlu0 }
 0x494   :  { %1130 = vst [vmem:[#allocation2] sm:$0xff] %v1114_v14 }
 0x495   :  { %1381 = shalt.err (!%p1378_p4)
}
 0x496   :  { %s1382_s27 = scalar_lea.hbm %s2590_s2, 128 }
 0x497   :  { %p1383_p5 = scmp.ne.s32.totalorder %s2590_s2, %s1382_s27  ;;  %p1386_p6 = scmp.lt.u32.totalorder %s1382_s27, %s2590_s2 }
 0x499   :  { %p1388_p7 = pnand %p1386_p6, %p1383_p5 }
 0x49b   :  { %1391 = shalt.err (!%p1388_p7)
}
 0x49c   :  { %1173 = dma.vmem_to_hbm [thread:$0]  %s1171_s1, 128, %s2590_s2, [#allocation3]   ;;  %1145 = vxpose.xlu1.b32.cont [15/16] (narrow) %v1096_v13, 8  ;;  %v2696_v9 = vld [vmem:[#allocation35_spill] sm:$0xff] }
 0x49d   :  { %v1048_v37 = vsel %vm1000_vm2, %v2696_v9, 0  ;;  %s1419_s7 = smov [#allocation4]  }
 0x49e   :  { %v1097_v12 = vsel %vm1049_vm3, %v855_v16, %v1048_v37  ;;  %s1180_s8 = sshll.u32 %s1419_s7, 4  ;;  %s1181_s8 = int_to_ptr.vmem [resolvable:$true] %s1180_s8 }
 0x49f   :  { %s1392_s9 = scalar_lea.vmem %s1181_s8, 128  ;;  %p1397_p9 = scmp.lt.s32.totalorder %s1181_s8, %s1181_s8 }
 0x4a0   :  { %1146 = vxpose.xlu1.b32.end [16/16] (narrow) %v1097_v12, 8  ;;  %p1393_p8 = scmp.ne.s32.totalorder %s1181_s8, %s1392_s9  ;;  %p1398_p10 = scmp.lt.s32.totalorder %s1392_s9, %s1392_s9 }
 0x4a2   :  { %p1399_p11 = por %p1398_p10, %p1397_p9 }
 0x4a4   :  { %p1400_p12 = pnand %p1399_p11, %p1393_p8 }
 0x4e4   :  { %v1147_v46 = vpop.trf.xlu1 }
 0x4e5   :  { %1163 = vst [vmem:[#allocation4] sm:$0xff] %v1147_v46 }
 0x4e6   :  { %1403 = shalt.err (!%p1400_p12)
}
 0x4e7   :  { %s1404_s11 = scalar_lea.hbm %s2591_s3, 128 }
 0x4e8   :  { %p1405_p13 = scmp.ne.s32.totalorder %s2591_s3, %s1404_s11  ;;  %p1408_p0 = scmp.lt.u32.totalorder %s1404_s11, %s2591_s3 }
 0x4ea   :  { %p1410_p1 = pnand %p1408_p0, %p1405_p13 }
 0x4ec   :  { %1413 = shalt.err (!%p1410_p1)
}
 0x4ed   :  { %1183 = dma.vmem_to_hbm [thread:$0]  %s1181_s8, 128, %s2591_s3, [#allocation5]  }
 0x4ee   :  { %1414 = dma.done.wait [#allocation3], 128  }
 0x4ef   :  { %1415 = vsyncadd [#allocation3], 4294967168 }
 0x4f0   :  { %1416 = dma.done.wait [#allocation5], 128  }
 0x4f1   :  { %1417 = vsyncadd [#allocation5], 4294967168 }
 0x4f2   :  { %1190 = vsyncpa [#allocation3], 1 }
 0x4f3   :  { %1191 = vsyncpa [#allocation5], 1 }

</bundles_post_ra>
